<compile_context>
chip_gen: v6e
topology: v6e:2x2x1
jax: 0.10.0
libtpu: 0.0.40
codegen_flags: <defaults>
</compile_context>

<pallas_src>
import functools

import jax
import jax.numpy as jnp
from jax.experimental import pallas as pl
from jax.experimental.pallas import tpu as pltpu


def _attn_pool_kernel(x_ref, m_ref, qt_ref, o_ref, *, cos_pooling):
    # x_ref : (TB, S, E)   input tile, TB batches packed per grid step, native dtype
    # m_ref : (TB, S, 1)   float32 additive mask (0 = keep, float32.min = masked)
    # qt_ref: (E, P)       query^T in the activation dtype (L2-normalized when cos_pooling)
    # o_ref : (TB, P*E)    lane-dense pooled output
    TB, S, E = x_ref.shape
    P = qt_ref.shape[1]

    x = x_ref[...]                                            # native dtype (MXU operand)

    # --- scores: one 2D MXU matmul over all packed batches (M = TB*S, K = E, N = P) ---
    # S == 8 keeps both reshapes layout-preserving (sublane dim stays a multiple of 8).
    # TODO(synk): for S not a multiple of 8 this reshape implies a relayout copy.
    x2d = x.reshape(TB * S, E)
    scores = jnp.dot(
        x2d, qt_ref[...], preferred_element_type=jnp.float32
    ).reshape(TB, S, P)                                       # (TB, S, P) f32

    if cos_pooling:
        # Fold 1/max(||x||, 1e-12) into the scores instead of materializing a normalized
        # copy of the (TB, S, E) tile: rsqrt(max(sum(x^2), 1e-24)).
        xf = x.astype(jnp.float32)
        ssq = jnp.sum(xf * xf, axis=-1, keepdims=True)        # (TB, S, 1) f32
        scores = scores * jax.lax.rsqrt(jnp.maximum(ssq, 1e-24))

    # Additive float32 mask; (TB, S, 1) broadcasts over the P lane axis with no relayout.
    scores = scores + m_ref[...]

    # --- numerically stable softmax over the sequence axis (axis=1) ---
    scores = scores - jnp.max(scores, axis=1, keepdims=True)
    e = jnp.exp(scores)
    attn = e / jnp.sum(e, axis=1, keepdims=True)              # exact divide: weights sum to 1

    # --- weighted sum over S on the VPU, written straight into the lane offsets of the
    #     lane-dense (TB, P*E) slab (no concat, no (TB,P,E) relayout, no padded K=S MXU) ---
    for p in range(P):
        w = attn[:, :, p:p + 1]                               # (TB, S, 1) f32
        pooled_p = jnp.sum(w * x, axis=1)                     # (TB, E) f32 (x promoted)
        o_ref[:, p * E:(p + 1) * E] = pooled_p.astype(o_ref.dtype)


def _device_info():
    """(vmem_capacity_bytes, tensorcores_per_device) with conservative fallbacks."""
    vmem = 64 << 20
    try:
        vmem = int(getattr(pltpu.get_tpu_info(), "vmem_capacity_bytes", vmem)) or vmem
    except Exception:
        pass
    num_tc = 1
    try:
        kind = jax.devices()[0].device_kind.lower()
        if any(tag in kind for tag in ("v4", "v5p", "v7")):   # multi-TC-per-device chips
            num_tc = 2
    except Exception:
        pass
    return vmem, num_tc


def _pick_block_b(B, S, E, itemsize, *, num_tc, max_block_bytes):
    """Pick a batch block that divides B.

    Single-TC chips (v5e/v6e): prefer ONE grid step (whole batch) if it fits the budget.
    Multi-TC chips (v4/v5p/v7x): require >= num_tc grid steps so both cores get work
    (the wrapper pads B to a multiple of 8*num_tc so this always succeeds)."""
    bytes_per = lambda tb: tb * S * E * itemsize
    if num_tc <= 1 and bytes_per(B) <= max_block_bytes:
        return B
    limit = B if num_tc <= 1 else B // num_tc
    best = None
    tb = 8
    while tb <= limit:
        if B % tb == 0 and bytes_per(tb) <= max_block_bytes:
            best = tb
        tb += 8
    if best is not None:
        return best
    # Whole-batch block: block dims equal to full array dims are always legal.
    return B


def attn_pooling_forward(x, mask, query, cos_pooling=True, block_b=None):
    B, S, E = x.shape
    P, Eq = query.shape
    assert Eq == E
    out_dtype = x.dtype

    # ---- grid-invariant math in plain JAX: query L2 norm + (P, P) decorrelation loss ----
    q32 = query.astype(jnp.float32)
    qn = q32 * jax.lax.rsqrt(
        jnp.maximum(jnp.sum(q32 * q32, axis=-1, keepdims=True), 1e-24))
    gram = qn @ qn.T
    gram = gram - jnp.diag(jnp.diag(gram))
    reg = jnp.sqrt(jnp.sum(gram * gram))

    # query^T (E, P), in the activation dtype so the MXU sees native-dtype operands.
    q_scores = qn if cos_pooling else q32
    qt = q_scores.T.astype(x.dtype)

    vmem_cap, num_tc = _device_info()

    # Pad the batch so multi-TC chips always have >= num_tc parallel blocks of a
    # multiple-of-8 size (padded rows: x = 0, mask = 0 -> finite output, sliced off below).
    B_pad = B
    mask_f32 = mask.astype(jnp.float32)
    if num_tc > 1:
        pad_mult = 8 * num_tc
        B_pad = ((B + pad_mult - 1) // pad_mult) * pad_mult
    if B_pad != B:
        x = jnp.pad(x, ((0, B_pad - B), (0, 0), (0, 0)))
        mask_f32 = jnp.pad(mask_f32, ((0, B_pad - B), (0, 0)))
    mask3d = mask_f32[:, :, None]                             # (B_pad, S, 1)

    itemsize = jnp.dtype(x.dtype).itemsize
    max_block_bytes = min(vmem_cap // 6, (20 << 20) if num_tc == 1 else (8 << 20))
    tb = block_b if block_b is not None else _pick_block_b(
        B_pad, S, E, itemsize, num_tc=num_tc, max_block_bytes=max_block_bytes)
    assert B_pad % tb == 0 and (tb % 8 == 0 or tb == B_pad)
    grid = (B_pad // tb,)

    # VMEM budget: double-buffered x / mask / out blocks + resident query + headroom,
    # capped at ~3/4 of physical VMEM for this generation.
    per_step = tb * S * E * itemsize + tb * S * 4 + tb * P * E * itemsize
    need = 2 * per_step + E * P * itemsize + (2 << 20)
    vmem_limit = int(min(max(need, 16 << 20), vmem_cap * 3 // 4))

    cost = pl.CostEstimate(
        flops=int(4 * B_pad * P * S * E + 2 * B_pad * S * E),
        transcendentals=int(B_pad * S * (P + 1)),
        bytes_accessed=int(B_pad * S * E * itemsize + B_pad * S * 4
                           + E * P * itemsize + B_pad * P * E * itemsize),
    )

    pooled = pl.pallas_call(
        functools.partial(_attn_pool_kernel, cos_pooling=cos_pooling),
        out_shape=jax.ShapeDtypeStruct((B_pad, P * E), out_dtype),
        grid=grid,
        in_specs=[
            pl.BlockSpec((tb, S, E), lambda i: (i, 0, 0)),    # packed batches of input
            pl.BlockSpec((tb, S, 1), lambda i: (i, 0, 0)),    # f32 additive mask
            pl.BlockSpec((E, P), lambda i: (0, 0)),           # grid-invariant query^T
        ],
        out_specs=pl.BlockSpec((tb, P * E), lambda i: (i, 0)),  # lane-dense output slab
        compiler_params=pltpu.CompilerParams(
            dimension_semantics=("parallel",),
            vmem_limit_bytes=vmem_limit,
        ),
        cost_estimate=cost,
    )(x, mask3d, qt)

    if B_pad != B:
        pooled = pooled[:B]
    return pooled, reg


def _reference(x, mask, query, cos_pooling):
    # plain-JAX transcription of the PyTorch forward, used only for verification
    eps = 1e-12
    qn = query / jnp.maximum(jnp.linalg.norm(query, axis=-1, keepdims=True), eps)
    if cos_pooling:
        xn = x / jnp.maximum(jnp.linalg.norm(x, axis=-1, keepdims=True), eps)
        scores = jnp.einsum("bse,pe->bps", xn, qn)
    else:
        scores = jnp.einsum("bse,pe->bps", x, query)
    scores = scores + mask[:, None, :]
    attn = jax.nn.softmax(scores, axis=-1)
    out = jnp.einsum("bps,bse->bpe", attn, x)
    g = qn @ qn.T
    off = g - jnp.diag(jnp.diag(g))
    reg = jnp.sqrt(jnp.sum(off ** 2))
    return out.reshape(out.shape[0], -1), reg


if __name__ == "__main__":
    key = jax.random.PRNGKey(0)
    B, S, E, P = 16, 8, 32, 4     # batch, seq_len, emb_dim, num_pooling
    k1, k2, k3 = jax.random.split(key, 3)

    x = jax.random.normal(k1, (B, S, E), dtype=jnp.float32)
    # deterministic synthetic "parameter": normal(mean=0, std=0.02), like the module init
    query = 0.02 * jax.random.normal(k2, (P, E), dtype=jnp.float32)

    # mask: 0 = keep, float32.min = masked (same convention as the PyTorch module)
    neg = jnp.finfo(jnp.float32).min
    keep = jax.random.uniform(k3, (B, S)) > 0.25
    keep = keep.at[:, 0].set(True)  # ensure at least one unmasked token per row
    mask = jnp.where(keep, 0.0, neg).astype(jnp.float32)

    out, reg = attn_pooling_forward(x, mask, query, cos_pooling=True)
    jax.block_until_ready((out, reg))

    ref_out, ref_reg = _reference(x, mask, query, True)
    assert out.shape == (B, P * E)
    # exact softmax division now -> tight tolerance (only residual exp/assoc differences)
    assert jnp.allclose(out, ref_out, atol=1e-4, rtol=1e-4)
    assert jnp.allclose(reg, ref_reg, atol=1e-5, rtol=1e-5)

    print("KERNEL_OK")
</pallas_src>

<mosaic_0001>
module attributes {stable_mosaic.version = 11 : i64} {
  func.func @_attn_pool_kernel(%arg0: i32, %arg1: memref<16x8x32xf32, #tpu.memory_space<vmem>>, %arg2: memref<16x8x1xf32, #tpu.memory_space<vmem>>, %arg3: memref<32x4xf32, #tpu.memory_space<vmem>>, %arg4: memref<16x128xf32, #tpu.memory_space<vmem>>) attributes {dimension_semantics = [#tpu.dimension_semantics<parallel>], iteration_bounds = array<i64: 1>, scalar_prefetch = 0 : i64, scratch_operands = 0 : i64, tpu.core_type = #tpu.core_type<tc>, window_params = [{transform_indices = @transform_0, window_bounds = array<i64: 16, 8, 32>}, {transform_indices = @transform_1, window_bounds = array<i64: 16, 8, 1>}, {pipeline_mode = #tpu.pipeline_mode<synchronous>, transform_indices = @transform_2, window_bounds = array<i64: 32, 4>}, {transform_indices = @transform_3, window_bounds = array<i64: 16, 128>}]} {
    %c0 = arith.constant 0 : index
    %c0_0 = arith.constant 0 : index
    %c0_1 = arith.constant 0 : index
    %0 = vector.load %arg1[%c0, %c0_0, %c0_1] : memref<16x8x32xf32, #tpu.memory_space<vmem>>, vector<16x8x32xf32>
    %1 = vector.shape_cast %0 : vector<16x8x32xf32> to vector<128x32xf32>
    %c0_2 = arith.constant 0 : index
    %c0_3 = arith.constant 0 : index
    %2 = vector.load %arg3[%c0_2, %c0_3] : memref<32x4xf32, #tpu.memory_space<vmem>>, vector<32x4xf32>
    %cst = arith.constant dense<0.000000e+00> : vector<128x4xf32>
    %3 = tpu.matmul %1, %2, %cst {dimension_numbers = #tpu.dot_dimension_numbers<[1], [0], [0], [1], [0, 0, 1, 1], [], []>} : vector<128x32xf32>, vector<32x4xf32>, vector<128x4xf32> -> vector<128x4xf32>
    %4 = vector.shape_cast %3 : vector<128x4xf32> to vector<16x8x4xf32>
    %5 = arith.mulf %0, %0 : vector<16x8x32xf32>
    %cst_4 = arith.constant dense<0.000000e+00> : vector<16x8xf32>
    %6 = vector.multi_reduction <add>, %5, %cst_4 [2] : vector<16x8x32xf32> to vector<16x8xf32>
    %7 = vector.shape_cast %6 : vector<16x8xf32> to vector<16x8x1xf32>
    %cst_5 = arith.constant 1.000000e-24 : f32
    %8 = vector.broadcast %cst_5 : f32 to vector<16x8x1xf32>
    %9 = arith.maximumf %7, %8 : vector<16x8x1xf32>
    %10 = math.rsqrt %9 : vector<16x8x1xf32>
    %11 = vector.broadcast %10 : vector<16x8x1xf32> to vector<16x8x4xf32>
    %12 = arith.mulf %4, %11 : vector<16x8x4xf32>
    %c0_6 = arith.constant 0 : index
    %c0_7 = arith.constant 0 : index
    %c0_8 = arith.constant 0 : index
    %13 = vector.load %arg2[%c0_6, %c0_7, %c0_8] : memref<16x8x1xf32, #tpu.memory_space<vmem>>, vector<16x8x1xf32>
    %14 = vector.broadcast %13 : vector<16x8x1xf32> to vector<16x8x4xf32>
    %15 = arith.addf %12, %14 : vector<16x8x4xf32>
    %cst_9 = arith.constant dense<0xFF800000> : vector<16x4xf32>
    %16 = vector.multi_reduction <maximumf>, %15, %cst_9 [1] : vector<16x8x4xf32> to vector<16x4xf32>
    %17 = vector.shape_cast %16 : vector<16x4xf32> to vector<16x1x4xf32>
    %18 = vector.broadcast %17 : vector<16x1x4xf32> to vector<16x8x4xf32>
    %19 = arith.subf %15, %18 : vector<16x8x4xf32>
    %20 = math.exp %19 : vector<16x8x4xf32>
    %cst_10 = arith.constant dense<0.000000e+00> : vector<16x4xf32>
    %21 = vector.multi_reduction <add>, %20, %cst_10 [1] : vector<16x8x4xf32> to vector<16x4xf32>
    %22 = vector.shape_cast %21 : vector<16x4xf32> to vector<16x1x4xf32>
    %23 = vector.broadcast %22 : vector<16x1x4xf32> to vector<16x8x4xf32>
    %24 = arith.divf %20, %23 : vector<16x8x4xf32>
    %25 = vector.extract_strided_slice %24 {offsets = [0, 0, 0], sizes = [16, 8, 1], strides = [1, 1, 1]} : vector<16x8x4xf32> to vector<16x8x1xf32>
    %26 = vector.broadcast %25 : vector<16x8x1xf32> to vector<16x8x32xf32>
    %27 = arith.mulf %26, %0 : vector<16x8x32xf32>
    %cst_11 = arith.constant dense<0.000000e+00> : vector<16x32xf32>
    %28 = vector.multi_reduction <add>, %27, %cst_11 [1] : vector<16x8x32xf32> to vector<16x32xf32>
    %c0_12 = arith.constant 0 : index
    %c0_13 = arith.constant 0 : index
    %29 = vector.load %arg4[%c0_12, %c0_13] : memref<16x128xf32, #tpu.memory_space<vmem>>, vector<16x32xf32>
    tpu.vector_store %arg4[%c0_12, %c0_13], %28 {strides = array<i32>} : memref<16x128xf32, #tpu.memory_space<vmem>>, vector<16x32xf32>,
    %30 = vector.extract_strided_slice %24 {offsets = [0, 0, 1], sizes = [16, 8, 1], strides = [1, 1, 1]} : vector<16x8x4xf32> to vector<16x8x1xf32>
    %31 = vector.broadcast %30 : vector<16x8x1xf32> to vector<16x8x32xf32>
    %32 = arith.mulf %31, %0 : vector<16x8x32xf32>
    %cst_14 = arith.constant dense<0.000000e+00> : vector<16x32xf32>
    %33 = vector.multi_reduction <add>, %32, %cst_14 [1] : vector<16x8x32xf32> to vector<16x32xf32>
    %c0_15 = arith.constant 0 : index
    %c32 = arith.constant 32 : index
    %34 = vector.load %arg4[%c0_15, %c32] : memref<16x128xf32, #tpu.memory_space<vmem>>, vector<16x32xf32>
    tpu.vector_store %arg4[%c0_15, %c32], %33 {strides = array<i32>} : memref<16x128xf32, #tpu.memory_space<vmem>>, vector<16x32xf32>,
    %35 = vector.extract_strided_slice %24 {offsets = [0, 0, 2], sizes = [16, 8, 1], strides = [1, 1, 1]} : vector<16x8x4xf32> to vector<16x8x1xf32>
    %36 = vector.broadcast %35 : vector<16x8x1xf32> to vector<16x8x32xf32>
    %37 = arith.mulf %36, %0 : vector<16x8x32xf32>
    %cst_16 = arith.constant dense<0.000000e+00> : vector<16x32xf32>
    %38 = vector.multi_reduction <add>, %37, %cst_16 [1] : vector<16x8x32xf32> to vector<16x32xf32>
    %c0_17 = arith.constant 0 : index
    %c64 = arith.constant 64 : index
    %39 = vector.load %arg4[%c0_17, %c64] : memref<16x128xf32, #tpu.memory_space<vmem>>, vector<16x32xf32>
    tpu.vector_store %arg4[%c0_17, %c64], %38 {strides = array<i32>} : memref<16x128xf32, #tpu.memory_space<vmem>>, vector<16x32xf32>,
    %40 = vector.extract_strided_slice %24 {offsets = [0, 0, 3], sizes = [16, 8, 1], strides = [1, 1, 1]} : vector<16x8x4xf32> to vector<16x8x1xf32>
    %41 = vector.broadcast %40 : vector<16x8x1xf32> to vector<16x8x32xf32>
    %42 = arith.mulf %41, %0 : vector<16x8x32xf32>
    %cst_18 = arith.constant dense<0.000000e+00> : vector<16x32xf32>
    %43 = vector.multi_reduction <add>, %42, %cst_18 [1] : vector<16x8x32xf32> to vector<16x32xf32>
    %c0_19 = arith.constant 0 : index
    %c96 = arith.constant 96 : index
    %44 = vector.load %arg4[%c0_19, %c96] : memref<16x128xf32, #tpu.memory_space<vmem>>, vector<16x32xf32>
    tpu.vector_store %arg4[%c0_19, %c96], %43 {strides = array<i32>} : memref<16x128xf32, #tpu.memory_space<vmem>>, vector<16x32xf32>,
    return
  }
  func.func @transform_0(%arg0: i32) -> (i32, i32, i32) {
    %c0_i32 = arith.constant 0 : i32
    %c0_i32_0 = arith.constant 0 : i32
    %c0_i32_1 = arith.constant 0 : i32
    return %arg0, %c0_i32, %c0_i32_0 : i32, i32, i32
  }
  func.func @transform_1(%arg0: i32) -> (i32, i32, i32) {
    %c0_i32 = arith.constant 0 : i32
    %c0_i32_0 = arith.constant 0 : i32
    %c0_i32_1 = arith.constant 0 : i32
    return %arg0, %c0_i32, %c0_i32_0 : i32, i32, i32
  }
  func.func @transform_2(%arg0: i32) -> (i32, i32) {
    %c0_i32 = arith.constant 0 : i32
    %c0_i32_0 = arith.constant 0 : i32
    %c0_i32_1 = arith.constant 0 : i32
    return %c0_i32, %c0_i32_0 : i32, i32
  }
  func.func @transform_3(%arg0: i32) -> (i32, i32) {
    %c0_i32 = arith.constant 0 : i32
    %c0_i32_0 = arith.constant 0 : i32
    return %arg0, %c0_i32 : i32, i32
  }
}

</mosaic_0001>

<bundles_post_ra>
// kernel: tpu_custom_call.1
= control target key start
LH: loop header
LB: loop body
LE: loop exit
PB: predicated region body
PF: predicated region fallthrough
CT: control target
= control target key end

     0   :  { %vm35_vm0 = vcmask 261120   ;;  %s2834_s0 = inlined_call_operand.vmem [shape: f32[16,8,32], index: 0, kind: input, shape index: {}]   ;;  %s2835_s1 = inlined_call_operand.vmem [shape: f32[16,8,1], index: 1, kind: input, shape index: {}]   ;;  %s2836_s2 = inlined_call_operand.vmem [shape: f32[32,4], index: 2, kind: input, shape index: {}]   ;;  %s2837_s3 = inlined_call_operand.hbm [shape: f32[16,128], index: 3, kind: output, shape index: {}]  }
   0x1   :  { %v34_v0 = vld [vmem:[%s2836_s2 + $0x18] sm:$0xff]  ;;  %v33_v1 = vld [vmem:[%s2836_s2 + $0x10] sm:$0xff]  ;;  %v32_v4 = vld [vmem:[%s2836_s2 + $0x8] sm:$0xff] }
   0x2   :  { %v17_v2 = vld [vmem:[%s2834_s0 + $0x10] sm:$0xff]  ;;  %1752 = vmatprep.subr.mxu0 %v34_v0  ;;  %1784 = vmatprep.subr.mxu1 %v34_v0  ;;  %v18_v5 = vld [vmem:[%s2834_s0 + $0x18] sm:$0xff]  ;;  %v15_v6 = vld [vmem:[%s2834_s0] sm:$0xff] }
   0x3   :  { %v231_v3 = vmul.f32 %v17_v2, %v17_v2  ;;  %1753 = vmatpush3.msra.mxu0 %v34_v0  ;;  %1788 = vmatpush3.msra.mxu1 %v34_v0  ;;  %v232_v8 = vmul.f32 %v18_v5, %v18_v5  ;;  %v31_v9 = vld [vmem:[%s2836_s2] sm:$0xff]  ;;  %v20_v10 = vld [vmem:[%s2834_s0 + $0x28] sm:$0xff]  ;;  %v229_v11 = vmul.f32 %v15_v6, %v15_v6  ;;  %v22_v17 = vld [vmem:[%s2834_s0 + $0x38] sm:$0xff] }
   0x4   :  { %1754 = vmatprep.subr.mxu0 %v33_v1  ;;  %1785 = vmatprep.subr.mxu1 %v33_v1  ;;  %v23_v12 = vld [vmem:[%s2834_s0 + $0x40] sm:$0xff]  ;;  %v234_v14 = vmul.f32 %v20_v10, %v20_v10  ;;  %v16_v15 = vld [vmem:[%s2834_s0 + $0x8] sm:$0xff]  ;;  %v25_v19 = vld [vmem:[%s2834_s0 + $0x50] sm:$0xff]  ;;  %v236_v23 = vmul.f32 %v22_v17, %v22_v17 }
   0x5   :  { %v251_v7 = vsel %vm35_vm0, %v231_v3, 0.0  ;;  %1755 = vmatpush3.msra.mxu0 %v33_v1  ;;  %1789 = vmatpush3.msra.mxu1 %v33_v1  ;;  %v254_v13 = vsel %vm35_vm0, %v232_v8, 0.0  ;;  %v24_v16 = vld [vmem:[%s2834_s0 + $0x48] sm:$0xff]  ;;  %v245_v18 = vsel %vm35_vm0, %v229_v11, 0.0  ;;  %v230_v20 = vmul.f32 %v16_v15, %v16_v15  ;;  %v19_v21 = vld [vmem:[%s2834_s0 + $0x20] sm:$0xff]  ;;  %v26_v24 = vld [vmem:[%s2834_s0 + $0x58] sm:$0xff] }
   0x6   :  { %252 = vadd.xlane.f32.xlu1 %v251_v7  ;;  %1756 = vmatprep.subr.mxu0 %v32_v4  ;;  %v260_v22 = vsel %vm35_vm0, %v234_v14, 0.0 }
   0x7   :  { %1786 = vmatprep.subr.mxu1 %v32_v4  ;;  %1757 = vmatpush3.msra.mxu0 %v32_v4 }
   0x8   :  { %1790 = vmatpush3.msra.mxu1 %v32_v4  ;;  %1758 = vmatprep.subr.mxu0 %v31_v9 }
   0x9   :  { %1787 = vmatprep.subr.mxu1 %v31_v9  ;;  %1759 = vmatpush3.msra.mxu0 %v31_v9 }
   0xa   :  { %1791 = vmatpush3.msra.mxu1 %v31_v9  ;;  %1772 = vmatprep.mubr.msk.f32.mxu1 %vm35_vm0, %v23_v12 }
   0xb   :  { %255 = vadd.xlane.f32.xlu1 %v254_v13  ;;  %1760 = vmatprep.mubr.msk.f32.mxu0 %vm35_vm0, %v15_v6 }
   0xc   :  { %1761 = vmatmul.mubr.msk.f32.vlgmr.msra.gmra.mxu0 %vm35_vm0, %v16_v15  ;;  %1773 = vmatmul.mubr.msk.f32.vlgmr.msra.gmra.mxu1 %vm35_vm0, %v24_v16 }
   0xd   :  { %246 = vadd.xlane.f32.xlu0 %v245_v18  ;;  %1775 = vmatprep.mubr.msk.f32.mxu1 %vm35_vm0, %v25_v19 }
   0xe   :  { %8 = vsyncpa [#allocation3], 0  ;;  %1763 = vmatprep.mubr.msk.f32.mxu0 %vm35_vm0, %v17_v2  ;;  %v248_v25 = vsel %vm35_vm0, %v230_v20, 0.0  ;;  %v27_v26 = vld [vmem:[%s2834_s0 + $0x60] sm:$0xff]  ;;  %v233_v27 = vmul.f32 %v19_v21, %v19_v21  ;;  %v1983_v28 = vmov 0   ;;  %v21_v29 = vld [vmem:[%s2834_s0 + $0x30] sm:$0xff]  ;;  %v238_v31 = vmul.f32 %v24_v16, %v24_v16 }
   0xf   :  { %1803 = vset.pattern.permute.xlu1 %v1983_v28  ;;  %1802 = vset.pattern.permute.xlu0 %v1983_v28  ;;  %v266_v30 = vsel %vm35_vm0, %v236_v23, 0.0  ;;  %v28_v32 = vld [vmem:[%s2834_s0 + $0x68] sm:$0xff]  ;;  %v29_v34 = vld [vmem:[%s2834_s0 + $0x70] sm:$0xff]  ;;  %v235_v35 = vmul.f32 %v21_v29, %v21_v29  ;;  %v240_v37 = vmul.f32 %v26_v24, %v26_v24  ;;  %v30_v38 = vld [vmem:[%s2834_s0 + $0x78] sm:$0xff]  ;;  %v237_v40 = vmul.f32 %v23_v12, %v23_v12  ;;  %s1988_s2 = smov 64   ;;  %s1989_s30 = smov 96  }
  0x10   :  { %261 = vadd.xlane.f32.xlu1 %v260_v22  ;;  %1764 = vmatmul.mubr.msk.f32.gmra.mxu0 %vm35_vm0, %v18_v5  ;;  %v257_v33 = vsel %vm35_vm0, %v233_v27, 0.0  ;;  %v272_v36 = vsel %vm35_vm0, %v238_v31, 0.0  ;;  %v242_v42 = vmul.f32 %v28_v32, %v28_v32  ;;  %v239_v44 = vmul.f32 %v25_v19, %v25_v19  ;;  %v342_v53 = vld [vmem:[%s2835_s1 + $0x8] sm:$0xff]  ;;  %v343_v54 = vld [vmem:[%s2835_s1 + $0x10] sm:$0xff]  ;;  %v344_v55 = vld [vmem:[%s2835_s1 + $0x18] sm:$0xff]  ;;  %s1990_s4 = smov [#allocation2]  }
  0x11   :  { %1776 = vmatmul.mubr.msk.f32.gmra.mxu1 %vm35_vm0, %v26_v24  ;;  %249 = vadd.xlane.f32.xlu0 %v248_v25  ;;  %v263_v39 = vsel %vm35_vm0, %v235_v35, 0.0  ;;  %v278_v41 = vsel %vm35_vm0, %v240_v37, 0.0  ;;  %v269_v43 = vsel %vm35_vm0, %v237_v40, 0.0  ;;  %v244_v46 = vmul.f32 %v30_v38, %v30_v38  ;;  %v341_v56 = vld [vmem:[%s2835_s1] sm:$0xff]  ;;  %v350_v58 = vld [vmem:[%s2835_s1 + $0x48] sm:$0xff]  ;;  %v352_v60 = vld [vmem:[%s2835_s1 + $0x58] sm:$0xff] }
  0x12   :  { %1778 = vmatprep.mubr.msk.f32.mxu1 %vm35_vm0, %v27_v26  ;;  %1766 = vmatprep.mubr.msk.f32.mxu0 %vm35_vm0, %v19_v21  ;;  %v284_v45 = vsel %vm35_vm0, %v242_v42, 0.0  ;;  %v275_v47 = vsel %vm35_vm0, %v239_v44, 0.0  ;;  %v241_v48 = vmul.f32 %v27_v26, %v27_v26  ;;  %v243_v51 = vmul.f32 %v29_v34, %v29_v34  ;;  %v345_v57 = vld [vmem:[%s2835_s1 + $0x20] sm:$0xff]  ;;  %v346_v59 = vld [vmem:[%s2835_s1 + $0x28] sm:$0xff]  ;;  %v347_v61 = vld [vmem:[%s2835_s1 + $0x30] sm:$0xff]  ;;  %s1705_s5 = sshll.u32 %s1990_s4, 4  ;;  %s1706_s5 = int_to_ptr.vmem [resolvable:$true] %s1705_s5 }
  0x13   :  { %v290_v49 = vsel %vm35_vm0, %v244_v46, 0.0  ;;  %v354_v62 = vld [vmem:[%s2835_s1 + $0x68] sm:$0xff]  ;;  %v348_v63 = vld [vmem:[%s2835_s1 + $0x38] sm:$0xff]  ;;  %v349_v1 = vld [vmem:[%s2835_s1 + $0x40] sm:$0xff]  ;;  %v1984_v15 = vmov 1   ;;  %vm453_vm1 = vcmask 31744   ;;  %p1966_p1 = scmp.lt.s32.totalorder %s1706_s5, %s1706_s5 }
  0x14   :  { %267 = vadd.xlane.f32.xlu1 %v266_v30  ;;  %1767 = vmatmul.mubr.msk.f32.gmra.mxu0 %vm35_vm0, %v20_v10  ;;  %v281_v50 = vsel %vm35_vm0, %v241_v48, 0.0  ;;  %v287_v52 = vsel %vm35_vm0, %v243_v51, 0.0  ;;  %v356_v0 = vld [vmem:[%s2835_s1 + $0x78] sm:$0xff]  ;;  %v351_v2 = vld [vmem:[%s2835_s1 + $0x50] sm:$0xff]  ;;  %v353_v3 = vld [vmem:[%s2835_s1 + $0x60] sm:$0xff]  ;;  %vm982_vm2 = vcmask 1041409  }
  0x15   :  { %1779 = vmatmul.mubr.msk.f32.gmra.mxu1 %vm35_vm0, %v28_v32  ;;  %258 = vadd.xlane.f32.xlu0 %v257_v33  ;;  %v355_v4 = vld [vmem:[%s2835_s1 + $0x70] sm:$0xff]  ;;  %vm984_vm3 = vcmask 1042434   ;;  %vm986_vm4 = vcmask 1043459   ;;  %vm988_vm5 = vcmask 1044484   ;;  %vm990_vm6 = vcmask 1045509   ;;  %s1961_s6 = scalar_lea.vmem %s1706_s5, 256 }
  0x16   :  { %1781 = vmatprep.mubr.msk.f32.mxu1 %vm35_vm0, %v29_v34  ;;  %1769 = vmatprep.mubr.msk.f32.mxu0 %vm35_vm0, %v21_v29  ;;  %vm994_vm7 = vcmask 1047559   ;;  %vm992_vm8 = vcmask 1046534   ;;  %vm1235_vm9 = vcmask 523520   ;;  %vm1466_vm10 = vcmask 785920   ;;  %p1962_p0 = scmp.ne.s32.totalorder %s1706_s5, %s1961_s6  ;;  %p1967_p2 = scmp.lt.s32.totalorder %s1961_s6, %s1961_s6 }
  0x17   :  { %vm1697_vm11 = vcmask 1048320  }
  0x18   :  { %273 = vadd.xlane.f32.xlu1 %v272_v36  ;;  %1770 = vmatmul.mubr.msk.f32.gmra.mxu0 %vm35_vm0, %v22_v17  ;;  %p1968_p3 = por %p1967_p2, %p1966_p1 }
  0x19   :  { %1782 = vmatmul.mubr.msk.f32.gmra.mxu1 %vm35_vm0, %v30_v38  ;;  %264 = vadd.xlane.f32.xlu0 %v263_v39 }
  0x1a   :  { %p1969_p4 = pnand %p1968_p3, %p1962_p0 }
  0x1c   :  { %279 = vadd.xlane.f32.xlu1 %v278_v41 }
  0x1d   :  { %270 = vadd.xlane.f32.xlu0 %v269_v43 }
  0x20   :  { %285 = vadd.xlane.f32.xlu1 %v284_v45 }
  0x21   :  { %276 = vadd.xlane.f32.xlu0 %v275_v47 }
  0x24   :  { %291 = vadd.xlane.f32.xlu1 %v290_v49 }
  0x25   :  { %282 = vadd.xlane.f32.xlu0 %v281_v50 }
  0x29   :  { %288 = vadd.xlane.f32.xlu0 %v287_v52 }
  0x35   :  { %364 = vperm.xlu1 %1803, %v342_v53  }
  0x39   :  { %369 = vperm.xlu1 %1803, %v343_v54  }
  0x3d   :  { %374 = vperm.xlu1 %1803, %v344_v55  }
  0x3f   :  { %359 = vperm.xlu0 %1802, %v341_v56  }
  0x41   :  { %379 = vperm.xlu1 %1803, %v345_v57  }
  0x43   :  { %404 = vperm.xlu0 %1802, %v350_v58  }
  0x45   :  { %384 = vperm.xlu1 %1803, %v346_v59  }
  0x47   :  { %414 = vperm.xlu0 %1802, %v352_v60  }
  0x49   :  { %389 = vperm.xlu1 %1803, %v347_v61  }
  0x4b   :  { %424 = vperm.xlu0 %1802, %v354_v62  }
  0x4d   :  { %394 = vperm.xlu1 %1803, %v348_v63  }
  0x4f   :  { %434 = vperm.xlu0 %1802, %v356_v0  }
  0x51   :  { %399 = vperm.xlu1 %1803, %v349_v1  }
  0x55   :  { %409 = vperm.xlu1 %1803, %v351_v2  }
  0x59   :  { %419 = vperm.xlu1 %1803, %v353_v3  }
  0x5d   :  { %429 = vperm.xlu1 %1803, %v355_v4  }
  0x61   :  { %1805 = vset.pattern.permute.xlu1 %v1984_v15 }
  0x8f   :  { %v2155_v5 = vpop.xlane.xlu1 %252 }
  0x94   :  { %v256_v6 = vpop.xlane.xlu1 %255 }
  0x95   :  { %v296_v30 = vmax.f32 %v256_v6, 1e-24 }
  0x96   :  { %v247_v8 = vpop.xlane.xlu0 %246 }
  0x97   :  { %v293_v29 = vmax.f32 %v247_v8, 1e-24 }
  0x99   :  { %v2157_v7 = vpop.xlane.xlu1 %261 }
  0x9a   :  { %v250_v10 = vpop.xlane.xlu0 %249 }
  0x9b   :  { %v294_v24 = vmax.f32 %v250_v10, 1e-24 }
  0x9d   :  { %v2159_v9 = vpop.xlane.xlu1 %267 }
  0x9e   :  { %v2161_v12 = vpop.xlane.xlu0 %258 }
  0x9f   :  { %v297_v1 = vmax.f32 %v2161_v12, 1e-24 }
  0xa1   :  { %v274_v11 = vpop.xlane.xlu1 %273 }
  0xa2   :  { %v2166_v16 = vpop.xlane.xlu0 %264  ;;  %v302_v23 = vmax.f32 %v274_v11, 1e-24 }
  0xa4   :  { %1849 = vrsqrt.f32 %v302_v23 }
  0xa5   :  { %v280_v13 = vpop.xlane.xlu1 %279  ;;  %1851 = vrsqrt.f32 %v294_v24  ;;  %v295_v24 = vmax.f32 %v2155_v5, 1e-24 }
  0xa6   :  { %v271_v18 = vpop.xlane.xlu0 %270  ;;  %v304_v33 = vmax.f32 %v280_v13, 1e-24 }
  0xa7   :  { %v301_v27 = vmax.f32 %v271_v18, 1e-24 }
  0xa9   :  { %v2163_v14 = vpop.xlane.xlu1 %285  ;;  %1853 = vrsqrt.f32 %v301_v27 }
  0xaa   :  { %v277_v21 = vpop.xlane.xlu0 %276  ;;  %1855 = vrsqrt.f32 %v293_v29 }
  0xab   :  { %1857 = vrsqrt.f32 %v296_v30  ;;  %v303_v61 = vmax.f32 %v277_v21, 1e-24 }
  0xac   :  { %1859 = vrsqrt.f32 %v304_v33 }
  0xad   :  { %v2168_v17 = vpop.xlane.xlu1 %291  ;;  %1861 = vrsqrt.f32 %v303_v61 }
  0xae   :  { %v2172_v25 = vpop.xlane.xlu0 %282  ;;  %1863 = vrsqrt.f32 %v297_v1 }
  0xaf   :  { %1865 = vrsqrt.f32 %v295_v24 }
  0xb1   :  { %v365_v19 = vpop.permute.xlu1 %364  ;;  %v1850_v37 = vpop.eup %1849 }
  0xb2   :  { %v2178_v32 = vpop.xlane.xlu0 %288  ;;  %v1852_v39 = vpop.eup %1851 }
  0xb5   :  { %v2170_v20 = vpop.permute.xlu1 %369 }
  0xb6   :  { %v1854_v42 = vpop.eup %1853 }
  0xb7   :  { %v1856_v46 = vpop.eup %1855 }
  0xb8   :  { %v1858_v53 = vpop.eup %1857 }
  0xb9   :  { %v375_v22 = vpop.permute.xlu1 %374  ;;  %v1860_v6 = vpop.eup %1859 }
  0xba   :  { %v360_v35 = vpop.permute.xlu0 %359 }
  0xbd   :  { %v2174_v26 = vpop.permute.xlu1 %379 }
  0xbe   :  { %v405_v43 = vpop.permute.xlu0 %404 }
  0xc1   :  { %v2176_v31 = vpop.permute.xlu1 %384 }
  0xc2   :  { %v415_v29 = vpop.permute.xlu0 %414 }
  0xc5   :  { %v2180_v34 = vpop.permute.xlu1 %389 }
  0xc9   :  { %v2182_v36 = vpop.permute.xlu1 %394 }
  0xcc   :  { %v1774_v38 = vpop.f32.mrf.mxu1  ;;  %v1762_v41 = vpop.f32.mrf.mxu0 }
  0xcd   :  { %v334_v40 = vmul.f32 %v1850_v37, %v1774_v38  ;;  %v326_v44 = vmul.f32 %v1852_v39, %v1762_v41  ;;  %v400_v50 = vpop.permute.xlu1 %399 }
  0xce   :  { %v190_v45 = vpop.f32.mrf.mxu1  ;;  %v150_v48 = vpop.f32.mrf.mxu0 }
  0xcf   :  { %v446_v47 = vadd.f32 %v405_v43, %v334_v40  ;;  %v333_v49 = vmul.f32 %v1854_v42, %v190_v45  ;;  %v438_v51 = vadd.f32 %v365_v19, %v326_v44  ;;  %v325_v52 = vmul.f32 %v1856_v46, %v150_v48 }
  0xd0   :  { %v1765_v56 = vpop.f32.mrf.mxu0  ;;  %v298_v42 = vmax.f32 %v2157_v7, 1e-24 }
  0xd1   :  { %v517_v54 = vsel %vm453_vm1, %v446_v47, -inf  ;;  %v2185_v55 = vadd.f32 %v400_v50, %v333_v49  ;;  %v461_v58 = vsel %vm453_vm1, %v438_v51, -inf  ;;  %v437_v59 = vadd.f32 %v360_v35, %v325_v52  ;;  %v1777_v0 = vpop.f32.mrf.mxu1 }
  0xd2   :  { %v518_v57 = vrot.slane %v517_v54, 4  ;;  %v328_v60 = vmul.f32 %v1858_v53, %v1765_v56  ;;  %v462_v62 = vrot.slane %v461_v58, 4  ;;  %v336_v18 = vmul.f32 %v1860_v6, %v1777_v0  ;;  %v160_v41 = vpop.f32.mrf.mxu0 }
  0xd3   :  { %v510_v63 = vsel %vm453_vm1, %v2185_v55, -inf  ;;  %v454_v3 = vsel %vm453_vm1, %v437_v59, -inf  ;;  %1867 = vrsqrt.f32 %v298_v42  ;;  %v299_v6 = vmax.f32 %v2166_v16, 1e-24 }
  0xd4   :  { %v519_v2 = vmax.f32 %v517_v54, %v518_v57  ;;  %v511_v4 = vrot.slane %v510_v63, 4  ;;  %v463_v8 = vmax.f32 %v461_v58, %v462_v62  ;;  %v455_v10 = vrot.slane %v454_v3, 4  ;;  %v1768_v53 = vpop.f32.mrf.mxu0  ;;  %v200_v62 = vpop.f32.mrf.mxu1 }
  0xd5   :  { %v2192_v19 = vadd.f32 %v375_v22, %v328_v60  ;;  %v2195_v38 = vadd.f32 %v415_v29, %v336_v18  ;;  %v306_v54 = vmax.f32 %v2163_v14, 1e-24 }
  0xd6   :  { %v520_v11 = vrot.slane %v519_v2, 2  ;;  %v512_v13 = vmax.f32 %v510_v63, %v511_v4  ;;  %v464_v21 = vrot.slane %v463_v8, 2  ;;  %v456_v23 = vmax.f32 %v454_v3, %v455_v10  ;;  %v170_v63 = vpop.f32.mrf.mxu0 }
  0xd7   :  { %v475_v39 = vsel %vm453_vm1, %v2192_v19, -inf  ;;  %v531_v49 = vsel %vm453_vm1, %v2195_v38, -inf }
  0xd8   :  { %v521_v27 = vmax.f32 %v519_v2, %v520_v11  ;;  %v513_v12 = vrot.slane %v512_v13, 2  ;;  %v465_v30 = vmax.f32 %v463_v8, %v464_v21  ;;  %v457_v33 = vrot.slane %v456_v23, 2  ;;  %v410_v8 = vpop.permute.xlu1 %409 }
  0xd9   :  { %v476_v46 = vrot.slane %v475_v39, 4  ;;  %v532_v7 = vrot.slane %v531_v49, 4 }
  0xda   :  { %v522_v35 = vrot.slane %v521_v27, 1  ;;  %v514_v37 = vmax.f32 %v512_v13, %v513_v12  ;;  %v466_v22 = vrot.slane %v465_v30, 1  ;;  %v458_v40 = vmax.f32 %v456_v23, %v457_v33 }
  0xdb   :  { %v477_v61 = vmax.f32 %v475_v39, %v476_v46  ;;  %v533_v2 = vmax.f32 %v531_v49, %v532_v7 }
  0xdc   :  { %v523_v5 = vmax.f32 %v521_v27, %v522_v35  ;;  %v515_v43 = vrot.slane %v514_v37, 1  ;;  %v467_v44 = vmax.f32 %v465_v30, %v466_v22  ;;  %v459_v45 = vrot.slane %v458_v40, 1 }
  0xdd   :  { %v478_v3 = vrot.slane %v477_v61, 2  ;;  %v534_v13 = vrot.slane %v533_v2, 2 }
  0xde   :  { %v575_v48 = vsub.f32 %v446_v47, %v523_v5  ;;  %v567_v50 = vsub.f32 %v438_v51, %v467_v44  ;;  %v460_v52 = vmax.f32 %v458_v40, %v459_v45  ;;  %v516_v57 = vmax.f32 %v514_v37, %v515_v43  ;;  %v1862_v47 = vpop.eup %1861  ;;  %v1780_v37 = vpop.f32.mrf.mxu1 }
  0xdf   :  { %v1864_v51 = vpop.eup %1863  ;;  %v335_v4 = vmul.f32 %v1862_v47, %v200_v62  ;;  %v479_v18 = vmax.f32 %v477_v61, %v478_v3  ;;  %v535_v24 = vmax.f32 %v533_v2, %v534_v13  ;;  %v305_v5 = vmax.f32 %v2172_v25, 1e-24  ;;  %v2229_v45 = vpop.f32.mrf.mxu0 }
  0xe0   :  { %v600_v56 = vmul.f32 1.442695, %v575_v48  ;;  %v584_v58 = vmul.f32 1.442695, %v567_v50  ;;  %v566_v60 = vsub.f32 %v437_v59, %v460_v52  ;;  %v574_v1 = vsub.f32 %v2185_v55, %v516_v57  ;;  %v1866_v11 = vpop.eup %1865 }
  0xe1   :  { %v329_v14 = vmul.f32 %v1864_v51, %v170_v63  ;;  %v2208_v21 = vadd.f32 %v410_v8, %v335_v4  ;;  %v327_v55 = vmul.f32 %v1866_v11, %v160_v41  ;;  %v1868_v23 = vpop.eup %1867  ;;  %v480_v27 = vrot.slane %v479_v18, 1 }
  0xe2   :  { %1869 = vpow2.f32 %v600_v56  ;;  %v582_v0 = vmul.f32 1.442695, %v566_v60  ;;  %v598_v59 = vmul.f32 1.442695, %v574_v1  ;;  %v536_v22 = vrot.slane %v535_v24, 1 }
  0xe3   :  { %1871 = vpow2.f32 %v584_v58  ;;  %v2206_v10 = vadd.f32 %v2174_v26, %v329_v14  ;;  %v524_v16 = vsel %vm453_vm1, %v2208_v21, -inf  ;;  %v2213_v12 = vadd.f32 %v2170_v20, %v327_v55 }
  0xe4   :  { %1873 = vrsqrt.f32 %v306_v54  ;;  %v330_v26 = vmul.f32 %v1868_v23, %v1768_v53  ;;  %v525_v35 = vrot.slane %v524_v16, 4  ;;  %v481_v40 = vmax.f32 %v479_v18, %v480_v27  ;;  %v425_v54 = vpop.permute.xlu0 %424 }
  0xe5   :  { %1875 = vpow2.f32 %v582_v0  ;;  %v468_v20 = vsel %vm453_vm1, %v2213_v12, -inf  ;;  %v537_v50 = vmax.f32 %v535_v24, %v536_v22  ;;  %v300_v4 = vmax.f32 %v2159_v9, 1e-24 }
  0xe6   :  { %1877 = vrsqrt.f32 %v299_v6  ;;  %v2227_v44 = vadd.f32 %v2176_v31, %v330_v26  ;;  %v526_v48 = vmax.f32 %v524_v16, %v525_v35  ;;  %v569_v52 = vsub.f32 %v2192_v19, %v481_v40  ;;  %v180_v31 = vpop.f32.mrf.mxu0 }
  0xe7   :  { %1879 = vpow2.f32 %v598_v59  ;;  %v469_v53 = vrot.slane %v468_v20, 4  ;;  %v577_v19 = vsub.f32 %v2195_v38, %v537_v50  ;;  %v308_v9 = vmax.f32 %v2168_v17, 1e-24 }
  0xe8   :  { %1881 = vrsqrt.f32 %v305_v5  ;;  %v489_v25 = vsel %vm453_vm1, %v2227_v44, -inf  ;;  %v527_v61 = vrot.slane %v526_v48, 2  ;;  %v588_v63 = vmul.f32 1.442695, %v569_v52 }
  0xe9   :  { %v470_v47 = vmax.f32 %v468_v20, %v469_v53  ;;  %v490_v1 = vrot.slane %v489_v25, 4  ;;  %v604_v8 = vmul.f32 1.442695, %v577_v19 }
  0xea   :  { %v528_v59 = vmax.f32 %v526_v48, %v527_v61  ;;  %1883 = vpow2.f32 %v588_v63 }
  0xeb   :  { %v471_v11 = vrot.slane %v470_v47, 2  ;;  %v491_v18 = vmax.f32 %v489_v25, %v490_v1  ;;  %1885 = vrsqrt.f32 %v300_v4 }
  0xec   :  { %v529_v16 = vrot.slane %v528_v59, 1  ;;  %1887 = vpow2.f32 %v604_v8 }
  0xed   :  { %v472_v26 = vmax.f32 %v470_v47, %v471_v11  ;;  %v492_v35 = vrot.slane %v491_v18, 2  ;;  %1889 = vrsqrt.f32 %v308_v9 }
  0xef   :  { %v2215_v29 = vpop.eup %1869  ;;  %v473_v5 = vrot.slane %v472_v26, 1  ;;  %v493_v48 = vmax.f32 %v491_v18, %v492_v35 }
  0xf0   :  { %v2217_v30 = vpop.eup %1871  ;;  %v677_v33 = vsel %vm453_vm1, %v2215_v29, 0.0 }
  0xf1   :  { %v621_v39 = vsel %vm453_vm1, %v2217_v30, 0.0  ;;  %v1874_v41 = vpop.eup %1873  ;;  %v678_v42 = vrot.slane %v677_v33, 4 }
  0xf2   :  { %v338_v43 = vmul.f32 %v1874_v41, %v1780_v37  ;;  %v622_v46 = vrot.slane %v621_v39, 4  ;;  %v2231_v49 = vpop.eup %1875  ;;  %v210_v37 = vpop.f32.mrf.mxu1 }
  0xf3   :  { %v679_v56 = vadd.f32 %v678_v42, %v677_v33  ;;  %v1878_v58 = vpop.eup %1877  ;;  %v614_v7 = vsel %vm453_vm1, %v2231_v49, 0.0  ;;  %v530_v42 = vmax.f32 %v528_v59, %v529_v16 }
  0xf4   :  { %v2234_v57 = vadd.f32 %v425_v54, %v338_v43  ;;  %v623_v60 = vadd.f32 %v622_v46, %v621_v39  ;;  %v2240_v62 = vpop.eup %1879  ;;  %v331_v51 = vmul.f32 %v1878_v58, %v180_v31  ;;  %v615_v2 = vrot.slane %v614_v7, 4  ;;  %v1783_v18 = vpop.f32.mrf.mxu1 }
  0xf5   :  { %v680_v0 = vrot.slane %v679_v56, 2  ;;  %v670_v6 = vsel %vm453_vm1, %v2240_v62, 0.0  ;;  %v1882_v41 = vpop.eup %1881  ;;  %v576_v53 = vsub.f32 %v2208_v21, %v530_v42  ;;  %v474_v54 = vmax.f32 %v472_v26, %v473_v5 }
  0xf6   :  { %v545_v3 = vsel %vm453_vm1, %v2234_v57, -inf  ;;  %v624_v14 = vrot.slane %v623_v60, 2  ;;  %v2249_v55 = vadd.f32 %v2180_v34, %v331_v51  ;;  %v616_v23 = vadd.f32 %v615_v2, %v614_v7 }
  0xf7   :  { %v681_v38 = vadd.f32 %v680_v0, %v679_v56  ;;  %v546_v13 = vrot.slane %v545_v3, 4  ;;  %v671_v24 = vrot.slane %v670_v6, 4  ;;  %v337_v43 = vmul.f32 %v1882_v41, %v210_v37  ;;  %v420_v56 = vpop.permute.xlu1 %419  ;;  %v2253_v25 = vpop.eup %1883 }
  0xf8   :  { %v625_v27 = vadd.f32 %v624_v14, %v623_v60  ;;  %v617_v22 = vrot.slane %v616_v23, 2  ;;  %v494_v58 = vrot.slane %v493_v48, 1  ;;  %v482_v60 = vsel %vm453_vm1, %v2206_v10, -inf  ;;  %v1886_v47 = vpop.eup %1885 }
  0xf9   :  { %v547_v33 = vmax.f32 %v545_v3, %v546_v13  ;;  %v682_v39 = vrot.slane %v681_v38, 1  ;;  %v672_v40 = vadd.f32 %v671_v24, %v670_v6  ;;  %v2257_v7 = vadd.f32 %v420_v56, %v337_v43  ;;  %v2262_v51 = vpop.eup %1887 }
  0xfa   :  { %v626_v34 = vrot.slane %v625_v27, 1  ;;  %v618_v17 = vadd.f32 %v617_v22, %v616_v23  ;;  %v602_v63 = vmul.f32 1.442695, %v576_v53  ;;  %v635_v0 = vsel %vm453_vm1, %v2253_v25, 0.0  ;;  %v1890_v23 = vpop.eup %1889 }
  0xfb   :  { %v683_v20 = vadd.f32 %v682_v39, %v681_v38  ;;  %v548_v46 = vrot.slane %v547_v33, 2  ;;  %v673_v52 = vrot.slane %v672_v40, 2  ;;  %v568_v21 = vsub.f32 %v2213_v12, %v474_v54 }
  0xfc   :  { %v627_v50 = vadd.f32 %v626_v34, %v625_v27  ;;  %v619_v19 = vrot.slane %v618_v17, 1  ;;  %v483_v1 = vrot.slane %v482_v60, 4  ;;  %v495_v3 = vmax.f32 %v493_v48, %v494_v58 }
  0xfd   :  { %1891 = vrcp.f32 %v683_v20  ;;  %v549_v31 = vmax.f32 %v547_v33, %v548_v46  ;;  %v674_v61 = vadd.f32 %v673_v52, %v672_v40  ;;  %v538_v4 = vsel %vm453_vm1, %v2257_v7, -inf  ;;  %v435_v20 = vpop.permute.xlu0 %434 }
  0xfe   :  { %1893 = vrcp.f32 %v627_v50  ;;  %v332_v14 = vmul.f32 %v1886_v47, %v2229_v45  ;;  %v620_v6 = vadd.f32 %v619_v19, %v618_v17  ;;  %v636_v8 = vrot.slane %v635_v0, 4 }
  0xff   :  { %v550_v2 = vrot.slane %v549_v31, 1  ;;  %v675_v59 = vrot.slane %v674_v61, 1  ;;  %1895 = vpow2.f32 %v602_v63  ;;  %v691_v11 = vsel %vm453_vm1, %v2262_v51, 0.0 }
 0x100   :  { %v586_v38 = vmul.f32 1.442695, %v568_v21  ;;  %v484_v13 = vmax.f32 %v482_v60, %v483_v1  ;;  %v539_v12 = vrot.slane %v538_v4, 4  ;;  %v571_v27 = vsub.f32 %v2227_v44, %v495_v3 }
 0x101   :  { %v551_v24 = vmax.f32 %v549_v31, %v550_v2  ;;  %v2271_v9 = vadd.f32 %v2182_v36, %v332_v14  ;;  %1897 = vrcp.f32 %v620_v6  ;;  %v676_v45 = vadd.f32 %v675_v59, %v674_v61  ;;  %v220_v59 = vpop.f32.mrf.mxu1 }
 0x102   :  { %v692_v26 = vrot.slane %v691_v11, 4  ;;  %v637_v33 = vadd.f32 %v636_v8, %v635_v0  ;;  %v340_v35 = vmul.f32 %v1890_v23, %v1783_v18  ;;  %v307_v22 = vmax.f32 %v2178_v32, 1e-24 }
 0x103   :  { %1899 = vpow2.f32 %v586_v38  ;;  %v485_v40 = vrot.slane %v484_v13, 2  ;;  %v540_v41 = vmax.f32 %v538_v4, %v539_v12  ;;  %v579_v44 = vsub.f32 %v2234_v57, %v551_v24 }
 0x104   :  { %v592_v42 = vmul.f32 1.442695, %v571_v27  ;;  %v503_v34 = vsel %vm453_vm1, %v2271_v9, -inf  ;;  %1901 = vrcp.f32 %v676_v45  ;;  %v638_v5 = vrot.slane %v637_v33, 2 }
 0x105   :  { %v2282_v43 = vadd.f32 %v435_v20, %v340_v35  ;;  %1903 = vrsqrt.f32 %v307_v22  ;;  %v486_v32 = vmax.f32 %v484_v13, %v485_v40  ;;  %v541_v46 = vrot.slane %v540_v41, 2  ;;  %v430_v22 = vpop.permute.xlu1 %429 }
 0x106   :  { %v608_v48 = vmul.f32 1.442695, %v579_v44  ;;  %1905 = vpow2.f32 %v592_v42  ;;  %v504_v57 = vrot.slane %v503_v34, 4  ;;  %v1985_v50 = vmov 2  }
 0x107   :  { %v639_v17 = vadd.f32 %v638_v5, %v637_v33  ;;  %v559_v52 = vsel %vm453_vm1, %v2282_v43, -inf  ;;  %v487_v54 = vrot.slane %v486_v32, 1  ;;  %v542_v56 = vmax.f32 %v540_v41, %v541_v46 }
 0x108   :  { %1907 = vpow2.f32 %v608_v48  ;;  %v505_v31 = vmax.f32 %v503_v34, %v504_v57  ;;  %v560_v58 = vrot.slane %v559_v52, 4  ;;  %v1986_v60 = vmov 3  }
 0x109   :  { %v640_v47 = vrot.slane %v639_v17, 1  ;;  %v488_v0 = vmax.f32 %v486_v32, %v487_v54  ;;  %v543_v21 = vrot.slane %v542_v56, 1  ;;  %v496_v42 = vsel %vm453_vm1, %v2249_v55, -inf }
 0x10a   :  { %v1892_v16 = vpop.eup %1891  ;;  %v506_v2 = vrot.slane %v505_v31, 2  ;;  %v561_v4 = vmax.f32 %v559_v52, %v560_v58  ;;  %v497_v32 = vrot.slane %v496_v42, 4 }
 0x10b   :  { %v2274_v37 = vmul.f32 %v1892_v16, %v2215_v29  ;;  %v1894_v39 = vpop.eup %1893  ;;  %v693_v29 = vadd.f32 %v692_v26, %v691_v11  ;;  %v641_v8 = vadd.f32 %v640_v47, %v639_v17  ;;  %v570_v13 = vsub.f32 %v2206_v10, %v488_v0 }
 0x10c   :  { %v729_v36 = vmul.f32 %v1894_v39, %v2217_v30  ;;  %v2289_v53 = vpop.eup %1895  ;;  %v544_v12 = vmax.f32 %v542_v56, %v543_v21  ;;  %v507_v23 = vmax.f32 %v505_v31, %v506_v2  ;;  %v562_v27 = vrot.slane %v561_v4, 2 }
 0x10d   :  { %1044 = vperm.xlu1 %1805, %v2274_v37   ;;  %v694_v30 = vrot.slane %v693_v29, 2  ;;  %v684_v63 = vsel %vm453_vm1, %v2289_v53, 0.0  ;;  %1909 = vrcp.f32 %v641_v8  ;;  %v590_v10 = vmul.f32 1.442695, %v570_v13 }
 0x10e   :  { %765 = vperm.xlu0 %1802, %v729_v36   ;;  %v1898_v61 = vpop.eup %1897  ;;  %v685_v3 = vrot.slane %v684_v63, 4  ;;  %v578_v35 = vsub.f32 %v2257_v7, %v544_v12  ;;  %v508_v40 = vrot.slane %v507_v23, 1  ;;  %v498_v54 = vmax.f32 %v496_v42, %v497_v32 }
 0x10f   :  { %v695_v19 = vadd.f32 %v694_v30, %v693_v29  ;;  %v2298_v14 = vmul.f32 %v1898_v61, %v2231_v49 }
 0x110   :  { %v2295_v1 = vpop.eup %1899  ;;  %v686_v24 = vadd.f32 %v685_v3, %v684_v63  ;;  %v606_v34 = vmul.f32 1.442695, %v578_v35  ;;  %v509_v5 = vmax.f32 %v507_v23, %v508_v40  ;;  %v499_v21 = vrot.slane %v498_v54, 2 }
 0x111   :  { %1807 = vset.pattern.permute.xlu1 %v1985_v50  ;;  %v1902_v6 = vpop.eup %1901  ;;  %v696_v11 = vrot.slane %v695_v19, 1  ;;  %v628_v38 = vsel %vm453_vm1, %v2295_v1, 0.0 }
 0x112   :  { %1275 = vperm.xlu1 %1807, %v2274_v37   ;;  %805 = vperm.xlu0 %1802, %v2274_v37   ;;  %v1904_v18 = vpop.eup %1903  ;;  %v2309_v45 = vmul.f32 %v1902_v6, %v2240_v62  ;;  %v629_v26 = vrot.slane %v628_v38, 4  ;;  %v687_v44 = vrot.slane %v686_v24, 2  ;;  %v563_v62 = vmax.f32 %v561_v4, %v562_v27 }
 0x113   :  { %v2306_v49 = vpop.eup %1905  ;;  %v339_v16 = vmul.f32 %v1904_v18, %v220_v59  ;;  %v697_v33 = vadd.f32 %v696_v11, %v695_v19  ;;  %v573_v52 = vsub.f32 %v2271_v9, %v509_v5 }
 0x114   :  { %v649_v39 = vsel %vm453_vm1, %v2306_v49, 0.0  ;;  %v630_v7 = vadd.f32 %v629_v26, %v628_v38  ;;  %v688_v46 = vadd.f32 %v687_v44, %v686_v24  ;;  %v564_v48 = vrot.slane %v563_v62, 1 }
 0x115   :  { %v2316_v41 = vpop.eup %1907  ;;  %1911 = vrcp.f32 %v697_v33  ;;  %v650_v20 = vrot.slane %v649_v39, 4  ;;  %v596_v0 = vmul.f32 1.442695, %v573_v52 }
 0x116   :  { %1808 = vset.pattern.permute.xlu1 %v1986_v60  ;;  %1804 = vset.pattern.permute.xlu0 %v1984_v15  ;;  %1913 = vpow2.f32 %v590_v10  ;;  %v705_v29 = vsel %vm453_vm1, %v2316_v41, 0.0  ;;  %v565_v31 = vmax.f32 %v563_v62, %v564_v48  ;;  %v689_v58 = vrot.slane %v688_v46, 1 }
 0x117   :  { %1474 = vperm.xlu1 %1808, %v729_v36   ;;  %1012 = vperm.xlu0 %1804, %v729_v36   ;;  %v706_v30 = vrot.slane %v705_v29, 4  ;;  %v651_v17 = vadd.f32 %v650_v20, %v649_v39  ;;  %1915 = vpow2.f32 %v606_v34 }
 0x118   :  { %v581_v9 = vsub.f32 %v2282_v43, %v565_v31  ;;  %v690_v3 = vadd.f32 %v689_v58, %v688_v46  ;;  %1917 = vpow2.f32 %v596_v0 }
 0x119   :  { %v707_v63 = vadd.f32 %v706_v30, %v705_v29  ;;  %v652_v47 = vrot.slane %v651_v17, 2 }
 0x11a   :  { %v1910_v19 = vpop.eup %1909  ;;  %v612_v12 = vmul.f32 1.442695, %v581_v9  ;;  %1919 = vrcp.f32 %v690_v3 }
 0x11b   :  { %1810 = vset.pattern.permute.xlu1 %v1983_v28  ;;  %1806 = vset.pattern.permute.xlu0 %v1985_v50  ;;  %v733_v4 = vmul.f32 %v1910_v19, %v2253_v25  ;;  %v708_v8 = vrot.slane %v707_v63, 2  ;;  %v653_v11 = vadd.f32 %v652_v47, %v651_v17 }
 0x11c   :  { %760 = vperm.xlu1 %1810, %v2298_v14   ;;  %1243 = vperm.xlu0 %1806, %v729_v36   ;;  %v2320_v36 = vadd.f32 %v430_v22, %v339_v16  ;;  %1921 = vpow2.f32 %v612_v12 }
 0x11d   :  { %v709_v18 = vadd.f32 %v708_v8, %v707_v63  ;;  %v654_v24 = vrot.slane %v653_v11, 1 }
 0x11e   :  { %v552_v57 = vsel %vm453_vm1, %v2320_v36, -inf }
 0x11f   :  { %v553_v56 = vrot.slane %v552_v57, 4  ;;  %v710_v10 = vrot.slane %v709_v18, 1 }
 0x120   :  { %800 = vperm.xlu1 %1810, %v2309_v45   ;;  %1809 = vset.pattern.permute.xlu0 %v1986_v60 }
 0x121   :  { %1506 = vperm.xlu0 %1809, %v2274_v37   ;;  %v631_v37 = vrot.slane %v630_v7, 2  ;;  %v554_v2 = vmax.f32 %v552_v57, %v553_v56  ;;  %v711_v44 = vadd.f32 %v710_v10, %v709_v18 }
 0x122   :  { %v1912_v59 = vpop.eup %1911 }
 0x123   :  { %v632_v61 = vadd.f32 %v631_v37, %v630_v7  ;;  %v2340_v38 = vpop.eup %1913  ;;  %v555_v13 = vrot.slane %v554_v2, 2  ;;  %v749_v25 = vmul.f32 %v1912_v59, %v2262_v51  ;;  %v655_v51 = vadd.f32 %v654_v24, %v653_v11 }
 0x124   :  { %1811 = vset.pattern.permute.xlu1 %v1984_v15  ;;  %v642_v23 = vsel %vm453_vm1, %v2340_v38, 0.0  ;;  %v2347_v27 = vpop.eup %1915 }
 0x125   :  { %1008 = vperm.xlu1 %1811, %v2298_v14   ;;  %1812 = vset.pattern.permute.xlu0 %v1984_v15  ;;  %v633_v6 = vrot.slane %v632_v61, 1  ;;  %v556_v26 = vmax.f32 %v554_v2, %v555_v13  ;;  %v643_v33 = vrot.slane %v642_v23, 4  ;;  %v2354_v7 = vpop.eup %1917 }
 0x126   :  { %1040 = vperm.xlu0 %1812, %v2309_v45   ;;  %v663_v46 = vsel %vm453_vm1, %v2354_v7, 0.0 }
 0x127   :  { %v634_v43 = vadd.f32 %v633_v6, %v632_v61  ;;  %v557_v39 = vrot.slane %v556_v26, 1  ;;  %v644_v22 = vadd.f32 %v643_v33, %v642_v23  ;;  %v1920_v20 = vpop.eup %1919  ;;  %v664_v17 = vrot.slane %v663_v46, 4 }
 0x129   :  { %1813 = vset.pattern.permute.xlu1 %v1985_v50  ;;  %1923 = vrcp.f32 %v634_v43  ;;  %v558_v42 = vmax.f32 %v556_v26, %v557_v39  ;;  %v645_v34 = vrot.slane %v644_v22, 2  ;;  %v2364_v48 = vpop.eup %1921  ;;  %v665_v61 = vadd.f32 %v664_v17, %v663_v46 }
 0x12a   :  { %1239 = vperm.xlu1 %1813, %v2298_v14   ;;  %1814 = vset.pattern.permute.xlu0 %v1986_v60  ;;  %1925 = vrcp.f32 %v655_v51 }
 0x12b   :  { %1470 = vperm.xlu0 %1814, %v2298_v14   ;;  %v500_v14 = vmax.f32 %v498_v54, %v499_v21  ;;  %1927 = vrcp.f32 %v711_v44  ;;  %v580_v32 = vsub.f32 %v2320_v36, %v558_v42  ;;  %v646_v57 = vadd.f32 %v645_v34, %v644_v22 }
 0x12c   :  { %v719_v36 = vsel %vm453_vm1, %v2364_v48, 0.0  ;;  %v666_v2 = vrot.slane %v665_v61, 2 }
 0x12d   :  { %v501_v16 = vrot.slane %v500_v14, 1  ;;  %v610_v52 = vmul.f32 1.442695, %v580_v32  ;;  %v647_v56 = vrot.slane %v646_v57, 1  ;;  %v720_v58 = vrot.slane %v719_v36, 4  ;;  %v2431_v32 = vld [vmem:[%s2834_s0 + $0x48] sm:$0xff] }
 0x12e   :  { %1271 = vperm.xlu1 %1813, %v2309_v45  }
 0x12f   :  { %1816 = vset.pattern.permute.xlu0 %v1983_v28  ;;  %v502_v35 = vmax.f32 %v500_v14, %v501_v16  ;;  %v648_v19 = vadd.f32 %v647_v56, %v646_v57  ;;  %v721_v21 = vadd.f32 %v720_v58, %v719_v36  ;;  %v1946_v57 = vld [vmem:[%s2834_s0 + $0x8] sm:$0xff] }
 0x130   :  { %775 = vperm.xlu0 %1816, %v733_v4  }
 0x131   :  { %v572_v62 = vsub.f32 %v2249_v55, %v502_v35  ;;  %v2362_v55 = vmul.f32 %v1920_v20, %v2289_v53  ;;  %v722_v3 = vrot.slane %v721_v21, 2 }
 0x132   :  { %1815 = vset.pattern.permute.xlu1 %v1986_v60 }
 0x133   :  { %1502 = vperm.xlu1 %1815, %v2309_v45   ;;  %v698_v45 = vsel %vm453_vm1, %v2347_v27, 0.0  ;;  %v594_v5 = vmul.f32 1.442695, %v572_v62 }
 0x134   :  { %815 = vperm.xlu0 %1816, %v749_v25   ;;  %v699_v40 = vrot.slane %v698_v45, 4 }
 0x135   :  { %1929 = vpow2.f32 %v594_v5 }
 0x136   :  { %v700_v29 = vadd.f32 %v699_v40, %v698_v45  ;;  %v1924_v30 = vpop.eup %1923  ;;  %1931 = vpow2.f32 %v610_v52 }
 0x137   :  { %1817 = vset.pattern.permute.xlu1 %v1984_v15  ;;  %v731_v54 = vmul.f32 %v1924_v30, %v2295_v1  ;;  %v1926_v31 = vpop.eup %1925  ;;  %1933 = vrcp.f32 %v648_v19 }
 0x138   :  { %1020 = vperm.xlu1 %1817, %v733_v4   ;;  %1819 = vset.pattern.permute.xlu0 %v1985_v50  ;;  %v701_v37 = vrot.slane %v700_v29, 2  ;;  %v2375_v47 = vmul.f32 %v1926_v31, %v2306_v49  ;;  %v1928_v0 = vpop.eup %1927  ;;  %v723_v49 = vadd.f32 %v722_v3, %v721_v21 }
 0x139   :  { %1283 = vperm.xlu0 %1819, %v749_v25   ;;  %v753_v9 = vmul.f32 %v1928_v0, %v2316_v41 }
 0x13a   :  { %v702_v53 = vadd.f32 %v701_v37, %v700_v29  ;;  %v724_v12 = vrot.slane %v723_v49, 1 }
 0x13c   :  { %1052 = vperm.xlu1 %1817, %v749_v25   ;;  %v703_v63 = vrot.slane %v702_v53, 1  ;;  %v725_v23 = vadd.f32 %v724_v12, %v723_v49  ;;  %v2450_v49 = vld [vmem:[%s2834_s0] sm:$0xff] }
 0x13d   :  { %1820 = vset.pattern.permute.xlu0 %v1986_v60 }
 0x13e   :  { %1482 = vperm.xlu0 %1820, %v733_v4   ;;  %v704_v1 = vadd.f32 %v703_v63, %v702_v53 }
 0x140   :  { %1818 = vset.pattern.permute.xlu1 %v1985_v50  ;;  %1935 = vrcp.f32 %v704_v1 }
 0x141   :  { %1251 = vperm.xlu1 %1818, %v733_v4   ;;  %v667_v4 = vadd.f32 %v666_v2, %v665_v61 }
 0x142   :  { %1824 = vset.pattern.permute.xlu0 %v1984_v15  ;;  %v2381_v6 = vpop.eup %1929 }
 0x143   :  { %1048 = vperm.xlu0 %1824, %v2362_v55   ;;  %v656_v59 = vsel %vm453_vm1, %v2381_v6, 0.0  ;;  %v668_v8 = vrot.slane %v667_v4, 1  ;;  %v2386_v11 = vpop.eup %1931 }
 0x144   :  { %v657_v41 = vrot.slane %v656_v59, 4  ;;  %v712_v14 = vsel %vm453_vm1, %v2386_v11, 0.0 }
 0x145   :  { %1821 = vset.pattern.permute.xlu1 %v1986_v60  ;;  %v669_v13 = vadd.f32 %v668_v8, %v667_v4  ;;  %v713_v18 = vrot.slane %v712_v14, 4 }
 0x146   :  { %1514 = vperm.xlu1 %1821, %v749_v25   ;;  %v1934_v25 = vpop.eup %1933  ;;  %v658_v43 = vadd.f32 %v657_v41, %v656_v59 }
 0x147   :  { %1825 = vset.pattern.permute.xlu0 %v1985_v50  ;;  %1937 = vrcp.f32 %v669_v13  ;;  %v735_v24 = vmul.f32 %v1934_v25, %v2340_v38  ;;  %v714_v33 = vadd.f32 %v713_v18, %v712_v14 }
 0x148   :  { %1247 = vperm.xlu0 %1825, %v731_v54   ;;  %v659_v26 = vrot.slane %v658_v43, 2  ;;  %1939 = vrcp.f32 %v725_v23 }
 0x149   :  { %v715_v10 = vrot.slane %v714_v33, 2 }
 0x14a   :  { %1822 = vset.pattern.permute.xlu1 %v1983_v28  ;;  %v660_v51 = vadd.f32 %v659_v26, %v658_v43  ;;  %v2461_v26 = vld [vmem:[%s2834_s0 + $0x40] sm:$0xff] }
 0x14b   :  { %770 = vperm.xlu1 %1822, %v731_v54   ;;  %v716_v35 = vadd.f32 %v715_v10, %v714_v33 }
 0x14c   :  { %1828 = vset.pattern.permute.xlu0 %v1983_v28  ;;  %v661_v38 = vrot.slane %v660_v51, 1 }
 0x14d   :  { %785 = vperm.xlu0 %1828, %v2375_v47   ;;  %v1936_v16 = vpop.eup %1935  ;;  %v717_v40 = vrot.slane %v716_v35, 1 }
 0x14e   :  { %v751_v45 = vmul.f32 %v1936_v16, %v2347_v27  ;;  %v662_v22 = vadd.f32 %v661_v38, %v660_v51 }
 0x14f   :  { %810 = vperm.xlu1 %1822, %v2362_v55   ;;  %v718_v27 = vadd.f32 %v717_v40, %v716_v35 }
 0x150   :  { %1941 = vrcp.f32 %v662_v22 }
 0x151   :  { %825 = vperm.xlu0 %1828, %v753_v9   ;;  %1943 = vrcp.f32 %v718_v27 }
 0x153   :  { %1823 = vset.pattern.permute.xlu1 %v1984_v15 }
 0x154   :  { %1016 = vperm.xlu1 %1823, %v731_v54   ;;  %v1938_v39 = vpop.eup %1937 }
 0x155   :  { %1831 = vset.pattern.permute.xlu0 %v1985_v50  ;;  %v741_v44 = vmul.f32 %v1938_v39, %v2354_v7  ;;  %v1940_v62 = vpop.eup %1939 }
 0x156   :  { %1291 = vperm.xlu0 %1831, %v753_v9   ;;  %v2408_v42 = vmul.f32 %v1940_v62, %v2364_v48 }
 0x158   :  { %1826 = vset.pattern.permute.xlu1 %v1985_v50 }
 0x159   :  { %1279 = vperm.xlu1 %1826, %v2362_v55  }
 0x15a   :  { %1832 = vset.pattern.permute.xlu0 %v1986_v60 }
 0x15b   :  { %1490 = vperm.xlu0 %1832, %v2375_v47  }
 0x15d   :  { %1827 = vset.pattern.permute.xlu1 %v1986_v60  ;;  %v1942_v7 = vpop.eup %1941 }
 0x15e   :  { %1478 = vperm.xlu1 %1827, %v731_v54   ;;  %v2418_v20 = vmul.f32 %v1942_v7, %v2381_v6  ;;  %v1944_v34 = vpop.eup %1943 }
 0x15f   :  { %1835 = vset.pattern.permute.xlu0 %v1984_v15  ;;  %v2424_v29 = vmul.f32 %v1944_v34, %v2386_v11 }
 0x160   :  { %1024 = vperm.xlu0 %1835, %v735_v24  }
 0x162   :  { %1510 = vperm.xlu1 %1827, %v2362_v55  }
 0x164   :  { %1056 = vperm.xlu0 %1835, %v751_v45  }
 0x166   :  { %1829 = vset.pattern.permute.xlu1 %v1984_v15 }
 0x167   :  { %1028 = vperm.xlu1 %1829, %v2375_v47  }
 0x168   :  { %1836 = vset.pattern.permute.xlu0 %v1985_v50 }
 0x169   :  { %1255 = vperm.xlu0 %1836, %v735_v24  }
 0x16b   :  { %1060 = vperm.xlu1 %1829, %v753_v9  }
 0x16d   :  { %1839 = vset.pattern.permute.xlu0 %v1983_v28 }
 0x16e   :  { %795 = vperm.xlu0 %1839, %v741_v44  }
 0x16f   :  { %1830 = vset.pattern.permute.xlu1 %v1985_v50 }
 0x170   :  { %1259 = vperm.xlu1 %1830, %v2375_v47  }
 0x172   :  { %835 = vperm.xlu0 %1839, %v2408_v42  }
 0x174   :  { %1833 = vset.pattern.permute.xlu1 %v1986_v60 }
 0x175   :  { %1522 = vperm.xlu1 %1833, %v753_v9  }
 0x176   :  { %1841 = vset.pattern.permute.xlu0 %v1984_v15 }
 0x177   :  { %1068 = vperm.xlu0 %1841, %v2408_v42  }
 0x179   :  { %1834 = vset.pattern.permute.xlu1 %v1983_v28 }
 0x17a   :  { %780 = vperm.xlu1 %1834, %v735_v24  }
 0x17b   :  { %1843 = vset.pattern.permute.xlu0 %v1985_v50 }
 0x17c   :  { %1299 = vperm.xlu0 %1843, %v2408_v42  }
 0x17e   :  { %820 = vperm.xlu1 %1834, %v751_v45  }
 0x180   :  { %1845 = vset.pattern.permute.xlu0 %v1984_v15 }
 0x181   :  { %1032 = vperm.xlu0 %1845, %v2418_v20  }
 0x182   :  { %1837 = vset.pattern.permute.xlu1 %v1985_v50 }
 0x183   :  { %1287 = vperm.xlu1 %1837, %v751_v45  }
 0x185   :  { %1064 = vperm.xlu0 %1845, %v2424_v29  }
 0x187   :  { %1838 = vset.pattern.permute.xlu1 %v1986_v60 }
 0x188   :  { %v1045_v5 = vpop.permute.xlu1 %1044  ;;  %1486 = vperm.xlu1 %1838, %v735_v24  }
 0x189   :  { %v1080_v46 = vmul.f32 %v2431_v32, %v1045_v5  ;;  %v766_v55 = vpop.permute.xlu0 %765  ;;  %1846 = vset.pattern.permute.xlu0 %v1986_v60 }
 0x18a   :  { %v839_v37 = vmul.f32 %v1946_v57, %v766_v55  ;;  %1498 = vperm.xlu0 %1846, %v741_v44  }
 0x18b   :  { %v1150_v48 = vsel %vm35_vm0, %v1080_v46, 0.0 }
 0x18c   :  { %1518 = vperm.xlu1 %1838, %v751_v45   ;;  %v861_v30 = vsel %vm35_vm0, %v839_v37, 0.0  ;;  %v1151_v52 = vrot.slane %v1150_v48, 4 }
 0x18d   :  { %v1276_v17 = vpop.permute.xlu1 %1275  ;;  %v806_v36 = vpop.permute.xlu0 %805  ;;  %v862_v53 = vrot.slane %v861_v30, 4 }
 0x18e   :  { %v847_v54 = vmul.f32 %v2431_v32, %v806_v36  ;;  %v1152_v31 = vadd.f32 %v1151_v52, %v1150_v48  ;;  %v1311_v61 = vmul.f32 %v2431_v32, %v1276_v17 }
 0x18f   :  { %v863_v63 = vadd.f32 %v862_v53, %v861_v30 }
 0x190   :  { %1840 = vset.pattern.permute.xlu1 %v1984_v15  ;;  %v917_v56 = vsel %vm35_vm0, %v847_v54, 0.0  ;;  %v1153_v1 = vrot.slane %v1152_v31, 2  ;;  %v1381_v9 = vsel %vm35_vm0, %v1311_v61, 0.0 }
 0x191   :  { %1036 = vperm.xlu1 %1840, %v741_v44   ;;  %v918_v58 = vrot.slane %v917_v56, 4  ;;  %v864_v15 = vrot.slane %v863_v63, 2  ;;  %v1382_v11 = vrot.slane %v1381_v9, 4 }
 0x192   :  { %v1475_v19 = vpop.permute.xlu1 %1474  ;;  %v1013_v47 = vpop.permute.xlu0 %1012  ;;  %v1154_v13 = vadd.f32 %v1153_v1, %v1152_v31 }
 0x193   :  { %v1072_v0 = vmul.f32 %v1946_v57, %v1013_v47  ;;  %v919_v21 = vadd.f32 %v918_v58, %v917_v56  ;;  %v1534_v2 = vmul.f32 %v1946_v57, %v1475_v19  ;;  %v865_v25 = vadd.f32 %v864_v15, %v863_v63 }
 0x194   :  { %v2464_v51 = vadd.f32 %v1382_v11, %v1381_v9  ;;  %v1155_v10 = vrot.slane %v1154_v13, 1 }
 0x195   :  { %1842 = vset.pattern.permute.xlu1 %v1985_v50  ;;  %v1094_v4 = vsel %vm35_vm0, %v1072_v0, 0.0  ;;  %v920_v8 = vrot.slane %v919_v21, 2  ;;  %v1556_v41 = vsel %vm35_vm0, %v1534_v2, 0.0 }
 0x196   :  { %1267 = vperm.xlu1 %1842, %v741_v44   ;;  %v1095_v43 = vrot.slane %v1094_v4, 4  ;;  %v1557_v23 = vrot.slane %v1556_v41, 4  ;;  %v866_v44 = vrot.slane %v865_v25, 1  ;;  %v1384_v5 = vrot.slane %v2464_v51, 2 }
 0x197   :  { %v761_v3 = vpop.permute.xlu1 %760  ;;  %v1244_v6 = vpop.permute.xlu0 %1243  ;;  %v921_v45 = vadd.f32 %v920_v8, %v919_v21  ;;  %v2469_v55 = vadd.f32 %v1155_v10, %v1154_v13 }
 0x198   :  { %v838_v59 = vmul.f32 %v2450_v49, %v761_v3  ;;  %v1303_v14 = vmul.f32 %v1946_v57, %v1244_v6  ;;  %v1096_v39 = vadd.f32 %v1095_v43, %v1094_v4  ;;  %v1558_v62 = vadd.f32 %v1557_v23, %v1556_v41 }
 0x199   :  { %v922_v34 = vrot.slane %v921_v45, 1  ;;  %v867_v54 = vadd.f32 %v866_v44, %v865_v25 }
 0x19a   :  { %v854_v12 = vsel %vm35_vm0, %v838_v59, 0.0  ;;  %1844 = vset.pattern.permute.xlu1 %v1983_v28  ;;  %v1325_v24 = vsel %vm35_vm0, %v1303_v14, 0.0  ;;  %v1097_v17 = vrot.slane %v1096_v39, 2  ;;  %v1559_v56 = vrot.slane %v1558_v62, 2 }
 0x19b   :  { %v801_v18 = vpop.permute.xlu1 %800  ;;  %790 = vperm.xlu1 %1844, %v2418_v20   ;;  %v855_v16 = vrot.slane %v854_v12, 4  ;;  %v1326_v22 = vrot.slane %v1325_v24, 4  ;;  %v923_v61 = vadd.f32 %v922_v34, %v921_v45 }
 0x19c   :  { %v846_v33 = vmul.f32 %v2461_v26, %v801_v18  ;;  %v1507_v28 = vpop.permute.xlu0 %1506  ;;  %v1560_v43 = vadd.f32 %v1559_v56, %v1558_v62 }
 0x19d   :  { %v856_v35 = vadd.f32 %v855_v16, %v854_v12  ;;  %v1542_v57 = vmul.f32 %v2431_v32, %v1507_v28  ;;  %v1327_v52 = vadd.f32 %v1326_v22, %v1325_v24 }
 0x19e   :  { %v910_v38 = vsel %vm35_vm0, %v846_v33, 0.0 }
 0x19f   :  { %v911_v40 = vrot.slane %v910_v38, 4  ;;  %830 = vperm.xlu1 %1844, %v2424_v29   ;;  %v857_v27 = vrot.slane %v856_v35, 2  ;;  %v1612_v21 = vsel %vm35_vm0, %v1542_v57, 0.0  ;;  %v1328_v9 = vrot.slane %v1327_v52, 2 }
 0x1a0   :  { %v1009_v7 = vpop.permute.xlu1 %1008  ;;  %v1613_v41 = vrot.slane %v1612_v21, 4 }
 0x1a1   :  { %v912_v46 = vadd.f32 %v911_v40, %v910_v38  ;;  %v858_v48 = vadd.f32 %v857_v27, %v856_v35  ;;  %v1041_v37 = vpop.permute.xlu0 %1040  ;;  %v1071_v30 = vmul.f32 %v2450_v49, %v1009_v7  ;;  %v1329_v28 = vadd.f32 %v1328_v9, %v1327_v52 }
 0x1a2   :  { %v1079_v53 = vmul.f32 %v2461_v26, %v1041_v37  ;;  %v1614_v22 = vadd.f32 %v1613_v41, %v1612_v21  ;;  %v1385_v27 = vadd.f32 %v1384_v5, %v2464_v51  ;;  %v1561_v7 = vrot.slane %v1560_v43, 1 }
 0x1a3   :  { %v913_v36 = vrot.slane %v912_v46, 2  ;;  %1847 = vset.pattern.permute.xlu1 %v1985_v50  ;;  %v859_v31 = vrot.slane %v858_v48, 1  ;;  %v1087_v58 = vsel %vm35_vm0, %v1071_v30, 0.0  ;;  %v1098_v50 = vadd.f32 %v1097_v17, %v1096_v39 }
 0x1a4   :  { %1263 = vperm.xlu1 %1847, %v2418_v20   ;;  %v1143_v32 = vsel %vm35_vm0, %v1079_v53, 0.0  ;;  %v1088_v63 = vrot.slane %v1087_v58, 4  ;;  %v1330_v52 = vrot.slane %v1329_v28, 1  ;;  %v1615_v56 = vrot.slane %v1614_v22, 2 }
 0x1a5   :  { %v914_v19 = vadd.f32 %v913_v36, %v912_v46  ;;  %v1240_v47 = vpop.permute.xlu1 %1239  ;;  %v860_v0 = vadd.f32 %v859_v31, %v858_v48  ;;  %v1144_v2 = vrot.slane %v1143_v32, 4  ;;  %v1099_v16 = vrot.slane %v1098_v50, 1 }
 0x1a6   :  { %v1302_v1 = vmul.f32 %v2450_v49, %v1240_v47  ;;  %v1089_v3 = vadd.f32 %v1088_v63, %v1087_v58  ;;  %v1471_v4 = vpop.permute.xlu0 %1470  ;;  %v1331_v21 = vadd.f32 %v1330_v52, %v1329_v28 }
 0x1a7   :  { %v915_v15 = vrot.slane %v914_v19, 1  ;;  %v2481_v6 = vsel %vm982_vm2, %v867_v54, %v860_v0  ;;  %v1145_v59 = vadd.f32 %v1144_v2, %v1143_v32  ;;  %v1533_v8 = vmul.f32 %v2450_v49, %v1471_v4 }
 0x1a8   :  { %v1318_v11 = vsel %vm35_vm0, %v1302_v1, 0.0  ;;  %1295 = vperm.xlu1 %1847, %v2424_v29   ;;  %v1090_v13 = vrot.slane %v1089_v3, 2  ;;  %v1100_v57 = vadd.f32 %v1099_v16, %v1098_v50  ;;  %v1562_v0 = vadd.f32 %v1561_v7, %v1560_v43 }
 0x1a9   :  { %v916_v14 = vadd.f32 %v915_v15, %v914_v19  ;;  %v1319_v12 = vrot.slane %v1318_v11, 4  ;;  %v1272_v25 = vpop.permute.xlu1 %1271  ;;  %v1146_v18 = vrot.slane %v1145_v59, 2  ;;  %v1549_v23 = vsel %vm35_vm0, %v1533_v8, 0.0 }
 0x1aa   :  { %v1310_v24 = vmul.f32 %v2461_v26, %v1272_v25  ;;  %v1091_v49 = vadd.f32 %v1090_v13, %v1089_v3  ;;  %v1550_v45 = vrot.slane %v1549_v23, 4  ;;  %v1386_v19 = vrot.slane %v1385_v27, 1  ;;  %v2520_v13 = vld [vmem:[%s2834_s0 + $0x18] sm:$0xff] }
 0x1ab   :  { %v2489_v33 = vsel %vm982_vm2, %v923_v61, %v916_v14  ;;  %v1147_v10 = vadd.f32 %v1146_v18, %v1145_v59  ;;  %v1320_v35 = vadd.f32 %v1319_v12, %v1318_v11  ;;  %v776_v39 = vpop.permute.xlu0 %775  ;;  %v1616_v1 = vadd.f32 %v1615_v56, %v1614_v22  ;;  %v2526_v18 = vld [vmem:[%s2834_s0 + $0x58] sm:$0xff] }
 0x1ac   :  { %v1374_v38 = vsel %vm35_vm0, %v1310_v24, 0.0  ;;  %1848 = vset.pattern.permute.xlu1 %v1986_v60  ;;  %v1092_v40 = vrot.slane %v1091_v49, 1  ;;  %v1551_v44 = vadd.f32 %v1550_v45, %v1549_v23  ;;  %v1387_v3 = vadd.f32 %v1386_v19, %v1385_v27 }
 0x1ad   :  { %v1375_v62 = vrot.slane %v1374_v38, 4  ;;  %1494 = vperm.xlu1 %1848, %v2418_v20   ;;  %v1148_v34 = vrot.slane %v1147_v10, 1  ;;  %v1321_v46 = vrot.slane %v1320_v35, 2  ;;  %v1617_v41 = vrot.slane %v1616_v1, 1 }
 0x1ae   :  { %v1503_v48 = vpop.permute.xlu1 %1502  ;;  %v1093_v37 = vadd.f32 %v1092_v40, %v1091_v49  ;;  %v1552_v30 = vrot.slane %v1551_v44, 2 }
 0x1af   :  { %v1376_v17 = vadd.f32 %v1375_v62, %v1374_v38  ;;  %v1149_v36 = vadd.f32 %v1148_v34, %v1147_v10  ;;  %v1322_v53 = vadd.f32 %v1321_v46, %v1320_v35  ;;  %v1541_v60 = vmul.f32 %v2461_v26, %v1503_v48  ;;  %v816_v54 = vpop.permute.xlu0 %815  ;;  %v2545_v48 = vld [vmem:[%s2834_s0 + $0x10] sm:$0xff] }
 0x1b0   :  { %v2497_v31 = vsel %vm982_vm2, %v1100_v57, %v1093_v37  ;;  %v1553_v20 = vadd.f32 %v1552_v30, %v1551_v44  ;;  %v849_v23 = vmul.f32 %v2526_v18, %v816_v54  ;;  %v1618_v16 = vadd.f32 %v1617_v41, %v1616_v1 }
 0x1b1   :  { %v1377_v51 = vrot.slane %v1376_v17, 2  ;;  %1526 = vperm.xlu1 %1848, %v2424_v29   ;;  %v2502_v5 = vsel %vm982_vm2, %v2469_v55, %v1149_v36  ;;  %v1323_v58 = vrot.slane %v1322_v53, 1  ;;  %v1605_v61 = vsel %vm35_vm0, %v1541_v60, 0.0 }
 0x1b2   :  { %v1554_v32 = vrot.slane %v1553_v20, 1  ;;  %v1606_v26 = vrot.slane %v1605_v61, 4 }
 0x1b3   :  { %v1378_v63 = vadd.f32 %v1377_v51, %v1376_v17  ;;  %v1021_v47 = vpop.permute.xlu1 %1020  ;;  %v1324_v2 = vadd.f32 %v1323_v58, %v1322_v53 }
 0x1b4   :  { %v1555_v50 = vadd.f32 %v1554_v32, %v1553_v20  ;;  %v1607_v15 = vadd.f32 %v1606_v26, %v1605_v61  ;;  %v1284_v29 = vpop.permute.xlu0 %1283  ;;  %v1074_v62 = vmul.f32 %v2520_v13, %v1021_v47  ;;  %v2558_v47 = vld [vmem:[%s2834_s0 + $0x50] sm:$0xff] }
 0x1b5   :  { %v1379_v9 = vrot.slane %v1378_v63, 1  ;;  %1530 = vperm.xlu1 %1848, %v2408_v42   ;;  %v2507_v55 = vsel %vm982_vm2, %v1331_v21, %v1324_v2  ;;  %v841_v42 = vmul.f32 %v2520_v13, %v776_v39  ;;  %v931_v39 = vsel %vm35_vm0, %v849_v23, 0.0 }
 0x1b6   :  { %v2510_v4 = vsel %vm982_vm2, %v1562_v0, %v1555_v50  ;;  %v1608_v8 = vrot.slane %v1607_v15, 2  ;;  %v932_v44 = vrot.slane %v931_v39, 4  ;;  %v1313_v46 = vmul.f32 %v2526_v18, %v1284_v29 }
 0x1b7   :  { %v1380_v59 = vadd.f32 %v1379_v9, %v1378_v63  ;;  %v2512_v11 = vpop.permute.xlu1 %1052  ;;  %v875_v49 = vsel %vm35_vm0, %v841_v42, 0.0  ;;  %v1108_v17 = vsel %vm35_vm0, %v1074_v62, 0.0 }
 0x1b8   :  { %v1609_v12 = vadd.f32 %v1608_v8, %v1607_v15  ;;  %v876_v38 = vrot.slane %v875_v49, 4  ;;  %v933_v30 = vadd.f32 %v932_v44, %v931_v39  ;;  %v1109_v51 = vrot.slane %v1108_v17, 4 }
 0x1b9   :  { %v2515_v14 = vsel %vm982_vm2, %v1387_v3, %v1380_v59  ;;  %v1483_v25 = vpop.permute.xlu0 %1482  ;;  %v1395_v58 = vsel %vm35_vm0, %v1313_v46, 0.0 }
 0x1ba   :  { %v1610_v43 = vrot.slane %v1609_v12, 1  ;;  %v877_v7 = vadd.f32 %v876_v38, %v875_v49  ;;  %v934_v32 = vrot.slane %v933_v30, 2  ;;  %v1396_v1 = vrot.slane %v1395_v58, 4 }
 0x1bb   :  { %v1110_v29 = vadd.f32 %v1109_v51, %v1108_v17  ;;  %v1536_v49 = vmul.f32 %v2520_v13, %v1483_v25 }
 0x1bc   :  { %v1252_v24 = vpop.permute.xlu1 %1251  ;;  %v1611_v45 = vadd.f32 %v1610_v43, %v1609_v12  ;;  %v878_v53 = vrot.slane %v877_v7, 2  ;;  %v935_v8 = vadd.f32 %v934_v32, %v933_v30 }
 0x1bd   :  { %v1305_v28 = vmul.f32 %v2520_v13, %v1252_v24  ;;  %v1111_v38 = vrot.slane %v1110_v29, 2  ;;  %v1570_v25 = vsel %vm35_vm0, %v1536_v49, 0.0 }
 0x1be   :  { %v2532_v10 = vsel %vm982_vm2, %v1618_v16, %v1611_v45  ;;  %v2534_v35 = vpop.permute.xlu0 %1048  ;;  %v879_v21 = vadd.f32 %v878_v53, %v877_v7  ;;  %v1397_v16 = vadd.f32 %v1396_v1, %v1395_v58  ;;  %v936_v62 = vrot.slane %v935_v8, 1 }
 0x1bf   :  { %v1339_v22 = vsel %vm35_vm0, %v1305_v28, 0.0  ;;  %v1112_v58 = vadd.f32 %v1111_v38, %v1110_v29 }
 0x1c0   :  { %v1340_v27 = vrot.slane %v1339_v22, 4  ;;  %v880_v43 = vrot.slane %v879_v21, 1  ;;  %v1398_v13 = vrot.slane %v1397_v16, 2  ;;  %v937_v51 = vadd.f32 %v936_v62, %v935_v8 }
 0x1c1   :  { %v2538_v40 = vpop.permute.xlu1 %1514 }
 0x1c2   :  { %v1341_v52 = vadd.f32 %v1340_v27, %v1339_v22  ;;  %v881_v46 = vadd.f32 %v880_v43, %v879_v21  ;;  %v1544_v53 = vmul.f32 %v2526_v18, %v2538_v40  ;;  %v1399_v21 = vadd.f32 %v1398_v13, %v1397_v16  ;;  %v2612_v13 = vld [vmem:[%s2834_s0 + $0x68] sm:$0xff] }
 0x1c3   :  { %v1248_v34 = vpop.permute.xlu0 %1247 }
 0x1c4   :  { %v1304_v57 = vmul.f32 %v2545_v48, %v1248_v34  ;;  %v1342_v63 = vrot.slane %v1341_v52, 2 }
 0x1c6   :  { %v771_v37 = vpop.permute.xlu1 %770  ;;  %v1332_v60 = vsel %vm35_vm0, %v1304_v57, 0.0  ;;  %v1343_v41 = vadd.f32 %v1342_v63, %v1341_v52  ;;  %v1081_v63 = vmul.f32 %v2558_v47, %v2534_v35  ;;  %v1113_v35 = vrot.slane %v1112_v58, 1 }
 0x1c7   :  { %v840_v36 = vmul.f32 %v2545_v48, %v771_v37  ;;  %v1333_v54 = vrot.slane %v1332_v60, 4 }
 0x1c8   :  { %v2552_v20 = vpop.permute.xlu0 %785  ;;  %v1344_v27 = vrot.slane %v1343_v41, 1 }
 0x1c9   :  { %v868_v56 = vsel %vm35_vm0, %v840_v36, 0.0  ;;  %v1334_v26 = vadd.f32 %v1333_v54, %v1332_v60 }
 0x1ca   :  { %v869_v61 = vrot.slane %v868_v56, 4  ;;  %v811_v19 = vpop.permute.xlu1 %810 }
 0x1cb   :  { %v848_v0 = vmul.f32 %v2558_v47, %v811_v19  ;;  %v1335_v50 = vrot.slane %v1334_v26, 2 }
 0x1cc   :  { %v870_v2 = vadd.f32 %v869_v61, %v868_v56  ;;  %v2562_v15 = vpop.permute.xlu0 %825  ;;  %v1345_v61 = vadd.f32 %v1344_v27, %v1343_v41  ;;  %v1157_v41 = vsel %vm35_vm0, %v1081_v63, 0.0  ;;  %v1114_v27 = vadd.f32 %v1113_v35, %v1112_v58 }
 0x1cd   :  { %v924_v9 = vsel %vm35_vm0, %v848_v0, 0.0  ;;  %v1336_v42 = vadd.f32 %v1335_v50, %v1334_v26  ;;  %v1626_v50 = vsel %vm35_vm0, %v1544_v53, 0.0 }
 0x1ce   :  { %v871_v3 = vrot.slane %v870_v2, 2  ;;  %v925_v59 = vrot.slane %v924_v9, 4  ;;  %v1627_v49 = vrot.slane %v1626_v50, 4 }
 0x1cf   :  { %v1017_v12 = vpop.permute.xlu1 %1016  ;;  %v1337_v45 = vrot.slane %v1336_v42, 1 }
 0x1d0   :  { %v872_v23 = vadd.f32 %v871_v3, %v870_v2  ;;  %v926_v24 = vadd.f32 %v925_v59, %v924_v9  ;;  %v1073_v28 = vmul.f32 %v2545_v48, %v1017_v12  ;;  %v1571_v2 = vrot.slane %v1570_v25, 4 }
 0x1d1   :  { %v2566_v44 = vpop.permute.xlu0 %1291  ;;  %v1338_v7 = vadd.f32 %v1337_v45, %v1336_v42  ;;  %v1082_v59 = vmul.f32 %v2526_v18, %v2512_v11 }
 0x1d2   :  { %v873_v39 = vrot.slane %v872_v23, 1  ;;  %v927_v22 = vrot.slane %v926_v24, 2  ;;  %v1101_v34 = vsel %vm35_vm0, %v1073_v28, 0.0  ;;  %v1572_v16 = vadd.f32 %v1571_v2, %v1570_v25 }
 0x1d3   :  { %v1102_v30 = vrot.slane %v1101_v34, 4  ;;  %v1447_v52 = vsel %vm984_vm3, %v1338_v7, %v2507_v55  ;;  %v1164_v18 = vsel %vm35_vm0, %v1082_v59, 0.0 }
 0x1d4   :  { %v874_v57 = vadd.f32 %v873_v39, %v872_v23  ;;  %v928_v37 = vadd.f32 %v927_v22, %v926_v24  ;;  %v1280_v17 = vpop.permute.xlu1 %1279  ;;  %v2581_v1 = vsel %vm986_vm4, %v1345_v61, %v1447_v52  ;;  %v1400_v24 = vrot.slane %v1399_v21, 1  ;;  %v2602_v22 = vld [vmem:[%s2834_s0 + $0x28] sm:$0xff] }
 0x1d5   :  { %v1312_v36 = vmul.f32 %v2558_v47, %v1280_v17  ;;  %v1103_v56 = vadd.f32 %v1102_v30, %v1101_v34  ;;  %v843_v62 = vmul.f32 %v2602_v22, %v2552_v20  ;;  %v1628_v30 = vadd.f32 %v1627_v49, %v1626_v50 }
 0x1d6   :  { %v985_v60 = vsel %vm984_vm3, %v874_v57, %v2481_v6  ;;  %v929_v54 = vrot.slane %v928_v37, 1  ;;  %v1491_v32 = vpop.permute.xlu0 %1490  ;;  %v851_v20 = vmul.f32 %v2612_v13, %v2562_v15 }
 0x1d7   :  { %v1388_v19 = vsel %vm35_vm0, %v1312_v36, 0.0  ;;  %v1104_v26 = vrot.slane %v1103_v56, 2  ;;  %v2584_v6 = vsel %vm986_vm4, %v881_v46, %v985_v60  ;;  %v889_v60 = vsel %vm35_vm0, %v843_v62, 0.0 }
 0x1d8   :  { %v930_v55 = vadd.f32 %v929_v54, %v928_v37  ;;  %v1389_v0 = vrot.slane %v1388_v19, 4  ;;  %v1401_v37 = vadd.f32 %v1400_v24, %v1399_v21  ;;  %v1315_v54 = vmul.f32 %v2612_v13, %v2566_v44 }
 0x1d9   :  { %v1479_v40 = vpop.permute.xlu1 %1478  ;;  %v1105_v29 = vadd.f32 %v1104_v26, %v1103_v56  ;;  %v1538_v58 = vmul.f32 %v2602_v22, %v1491_v32  ;;  %v945_v44 = vsel %vm35_vm0, %v851_v20, 0.0 }
 0x1da   :  { %v997_v9 = vsel %vm984_vm3, %v930_v55, %v2489_v33  ;;  %v1390_v3 = vadd.f32 %v1389_v0, %v1388_v19  ;;  %v1535_v8 = vmul.f32 %v2545_v48, %v1479_v40  ;;  %v1158_v48 = vrot.slane %v1157_v41, 4 }
 0x1db   :  { %v1106_v42 = vrot.slane %v1105_v29, 1  ;;  %v1025_v43 = vpop.permute.xlu0 %1024  ;;  %v2594_v23 = vsel %vm986_vm4, %v937_v51, %v997_v9  ;;  %v1165_v19 = vrot.slane %v1164_v18, 4  ;;  %v1629_v0 = vrot.slane %v1628_v30, 2 }
 0x1dc   :  { %v1391_v12 = vrot.slane %v1390_v3, 2  ;;  %v1563_v33 = vsel %vm35_vm0, %v1535_v8, 0.0  ;;  %v1159_v53 = vadd.f32 %v1158_v48, %v1157_v41  ;;  %v890_v9 = vrot.slane %v889_v60, 4  ;;  %v2638_v41 = vld [vmem:[%s2834_s0 + $0x20] sm:$0xff] }
 0x1dd   :  { %v1511_v45 = vpop.permute.xlu1 %1510  ;;  %v1107_v28 = vadd.f32 %v1106_v42, %v1105_v29  ;;  %v1564_v39 = vrot.slane %v1563_v33, 4  ;;  %v1584_v32 = vsel %vm35_vm0, %v1538_v58, 0.0  ;;  %v1166_v35 = vadd.f32 %v1165_v19, %v1164_v18 }
 0x1de   :  { %v1392_v38 = vadd.f32 %v1391_v12, %v1390_v3  ;;  %v1543_v11 = vmul.f32 %v2558_v47, %v1511_v45  ;;  %v1573_v47 = vrot.slane %v1572_v16, 2  ;;  %v1160_v50 = vrot.slane %v1159_v53, 2 }
 0x1df   :  { %v1216_v7 = vsel %vm984_vm3, %v1107_v28, %v2497_v31  ;;  %v1565_v46 = vadd.f32 %v1564_v39, %v1563_v33  ;;  %v1057_v57 = vpop.permute.xlu0 %1056  ;;  %v946_v8 = vrot.slane %v945_v44, 4  ;;  %v1075_v42 = vmul.f32 %v2638_v41, %v1025_v43 }
 0x1e0   :  { %v1393_v34 = vrot.slane %v1392_v38, 1  ;;  %v1619_v17 = vsel %vm35_vm0, %v1543_v11, 0.0  ;;  %v2622_v56 = vsel %vm986_vm4, %v1114_v27, %v1216_v7  ;;  %v1574_v63 = vadd.f32 %v1573_v47, %v1572_v16 }
 0x1e1   :  { %v1566_v52 = vrot.slane %v1565_v46, 2  ;;  %v1620_v36 = vrot.slane %v1619_v17, 4  ;;  %v1630_v12 = vadd.f32 %v1629_v0, %v1628_v30  ;;  %v1161_v45 = vadd.f32 %v1160_v50, %v1159_v53  ;;  %v2669_v0 = vld [vmem:[%s2834_s0 + $0x78] sm:$0xff] }
 0x1e2   :  { %v1394_v25 = vadd.f32 %v1393_v34, %v1392_v38  ;;  %v2616_v31 = vpop.permute.xlu1 %1028  ;;  %v1575_v59 = vrot.slane %v1574_v63, 1  ;;  %v891_v28 = vadd.f32 %v890_v9, %v889_v60  ;;  %v1585_v38 = vrot.slane %v1584_v32, 4 }
 0x1e3   :  { %v1567_v15 = vadd.f32 %v1566_v52, %v1565_v46  ;;  %v1621_v61 = vadd.f32 %v1620_v36, %v1619_v17  ;;  %v1167_v18 = vrot.slane %v1166_v35, 2  ;;  %v947_v62 = vadd.f32 %v946_v8, %v945_v44 }
 0x1e4   :  { %v1454_v51 = vsel %vm984_vm3, %v1394_v25, %v2515_v14  ;;  %v2627_v55 = vpop.permute.xlu0 %1255  ;;  %v1409_v14 = vsel %vm35_vm0, %v1315_v54, 0.0  ;;  %v1576_v48 = vadd.f32 %v1575_v59, %v1574_v63  ;;  %v1115_v27 = vsel %vm35_vm0, %v1075_v42, 0.0 }
 0x1e5   :  { %v2630_v26 = vsel %vm986_vm4, %v1401_v37, %v1454_v51  ;;  %v1568_v21 = vrot.slane %v1567_v15, 1  ;;  %v1622_v2 = vrot.slane %v1621_v61, 2  ;;  %v1410_v24 = vrot.slane %v1409_v14, 4 }
 0x1e6   :  { %v1061_v40 = vpop.permute.xlu1 %1060  ;;  %v1631_v43 = vrot.slane %v1630_v12, 1  ;;  %v1162_v47 = vrot.slane %v1161_v45, 1  ;;  %v892_v30 = vrot.slane %v891_v28, 2  ;;  %v1586_v17 = vadd.f32 %v1585_v38, %v1584_v32 }
 0x1e7   :  { %v1569_v29 = vadd.f32 %v1568_v21, %v1567_v15  ;;  %v1623_v3 = vadd.f32 %v1622_v2, %v1621_v61  ;;  %v1411_v7 = vadd.f32 %v1410_v24, %v1409_v14  ;;  %v1116_v20 = vrot.slane %v1115_v27, 4 }
 0x1e8   :  { %v1084_v25 = vmul.f32 %v2612_v13, %v1061_v40  ;;  %v948_v53 = vrot.slane %v947_v62, 2  ;;  %v1632_v60 = vadd.f32 %v1631_v43, %v1630_v12  ;;  %v893_v58 = vadd.f32 %v892_v30, %v891_v28 }
 0x1e9   :  { %v1678_v16 = vsel %vm984_vm3, %v1569_v29, %v2510_v4  ;;  %v1624_v49 = vrot.slane %v1623_v3, 1  ;;  %v2643_v33 = vpop.permute.xlu0 %795  ;;  %v2653_v4 = vld [vmem:[%s2834_s0 + $0x60] sm:$0xff]  ;;  %v1412_v54 = vrot.slane %v1411_v7, 2  ;;  %v1587_v15 = vrot.slane %v1586_v17, 2 }
 0x1ea   :  { %v1083_v46 = vmul.f32 %v2653_v4, %v1057_v57  ;;  %v2662_v36 = vsel %vm986_vm4, %v1576_v48, %v1678_v16  ;;  %v1163_v57 = vadd.f32 %v1162_v47, %v1161_v45  ;;  %v1117_v19 = vadd.f32 %v1116_v20, %v1115_v27 }
 0x1eb   :  { %v2645_v39 = vpop.permute.xlu1 %1259  ;;  %v1625_v11 = vadd.f32 %v1624_v49, %v1623_v3  ;;  %v1178_v63 = vsel %vm35_vm0, %v1084_v25, 0.0  ;;  %v949_v40 = vadd.f32 %v948_v53, %v947_v62  ;;  %v1413_v14 = vadd.f32 %v1412_v54, %v1411_v7 }
 0x1ec   :  { %v1171_v51 = vsel %vm35_vm0, %v1083_v46, 0.0  ;;  %v1076_v32 = vmul.f32 %v2602_v22, %v2616_v31  ;;  %v1223_v3 = vsel %vm984_vm3, %v1163_v57, %v2502_v5  ;;  %v1179_v59 = vrot.slane %v1178_v63, 4 }
 0x1ed   :  { %v1685_v34 = vsel %vm984_vm3, %v1625_v11, %v2532_v10  ;;  %v2656_v37 = vpop.permute.xlu0 %835  ;;  %v1168_v10 = vadd.f32 %v1167_v18, %v1166_v35  ;;  %v1172_v50 = vrot.slane %v1171_v51, 4  ;;  %v894_v35 = vrot.slane %v893_v58, 1 }
 0x1ee   :  { %v2673_v21 = vsel %vm986_vm4, %v1632_v60, %v1685_v34  ;;  %v1588_v8 = vadd.f32 %v1587_v15, %v1586_v17  ;;  %v1118_v42 = vrot.slane %v1117_v19, 2  ;;  %v950_v45 = vrot.slane %v949_v40, 1 }
 0x1ef   :  { %v1169_v2 = vrot.slane %v1168_v10, 1  ;;  %v1173_v28 = vadd.f32 %v1172_v50, %v1171_v51  ;;  %v1414_v11 = vrot.slane %v1413_v14, 1  ;;  %v1122_v18 = vsel %vm35_vm0, %v1076_v32, 0.0  ;;  %v2701_v51 = vld [vmem:[%s2834_s0 + $0x30] sm:$0xff] }
 0x1f0   :  { %v2659_v52 = vpop.permute.xlu1 %1522  ;;  %v1180_v48 = vadd.f32 %v1179_v59, %v1178_v63  ;;  %v895_v7 = vadd.f32 %v894_v35, %v893_v58  ;;  %v1589_v34 = vrot.slane %v1588_v8, 1  ;;  %v2689_v46 = vadd.f32 %v1118_v42, %v1117_v19 }
 0x1f1   :  { %v1170_v49 = vadd.f32 %v1169_v2, %v1168_v10  ;;  %v2692_v30 = vadd.f32 %v950_v45, %v949_v40  ;;  %v1174_v17 = vrot.slane %v1173_v28, 2  ;;  %v1123_v20 = vrot.slane %v1122_v18, 4 }
 0x1f2   :  { %v1069_v61 = vpop.permute.xlu0 %1068  ;;  %v2694_v53 = vadd.f32 %v1414_v11, %v1413_v14  ;;  %v1306_v60 = vmul.f32 %v2638_v41, %v2627_v55  ;;  %v1181_v15 = vrot.slane %v1180_v48, 2  ;;  %v1120_v2 = vrot.slane %v2689_v46, 1 }
 0x1f3   :  { %v1086_v44 = vmul.f32 %v2669_v0, %v1069_v61  ;;  %v2687_v43 = vsel %vm986_vm4, %v1170_v49, %v1223_v3  ;;  %v1175_v50 = vadd.f32 %v1174_v17, %v1173_v28 }
 0x1f4   :  { %v2711_v3 = vsel %vm35_vm0, %v1306_v60, 0.0 }
 0x1f5   :  { %v781_v9 = vpop.permute.xlu1 %780  ;;  %v1192_v12 = vsel %vm35_vm0, %v1086_v44, 0.0  ;;  %v2705_v44 = vadd.f32 %v1589_v34, %v1588_v8  ;;  %v2716_v8 = vld [vmem:[%s2834_s0 + $0x70] sm:$0xff] }
 0x1f6   :  { %v842_v29 = vmul.f32 %v2638_v41, %v781_v9  ;;  %v1193_v62 = vrot.slane %v1192_v12, 4  ;;  %v1124_v9 = vadd.f32 %v1123_v20, %v1122_v18 }
 0x1f7   :  { %v2682_v16 = vpop.permute.xlu0 %1299 }
 0x1f8   :  { %v882_v24 = vsel %vm35_vm0, %v842_v29, 0.0  ;;  %v1194_v61 = vadd.f32 %v1193_v62, %v1192_v12  ;;  %v1182_v12 = vadd.f32 %v1181_v15, %v1180_v48  ;;  %v1125_v62 = vrot.slane %v1124_v9, 2 }
 0x1f9   :  { %v883_v38 = vrot.slane %v882_v24, 4  ;;  %v821_v31 = vpop.permute.xlu1 %820 }
 0x1fa   :  { %v850_v5 = vmul.f32 %v2653_v4, %v821_v31 }
 0x1fb   :  { %v884_v27 = vadd.f32 %v883_v38, %v882_v24  ;;  %v1195_v24 = vrot.slane %v1194_v61, 2 }
 0x1fc   :  { %v938_v47 = vsel %vm35_vm0, %v850_v5, 0.0  ;;  %v1033_v10 = vpop.permute.xlu0 %1032  ;;  %v1176_v5 = vrot.slane %v1175_v50, 1 }
 0x1fd   :  { %v885_v25 = vrot.slane %v884_v27, 2  ;;  %v939_v54 = vrot.slane %v938_v47, 4  ;;  %v1077_v57 = vmul.f32 %v2701_v51, %v1033_v10 }
 0x1fe   :  { %v1288_v58 = vpop.permute.xlu1 %1287 }
 0x1ff   :  { %v886_v19 = vadd.f32 %v885_v25, %v884_v27  ;;  %v1314_v63 = vmul.f32 %v2653_v4, %v1288_v58  ;;  %v940_v40 = vadd.f32 %v939_v54, %v938_v47  ;;  %v1129_v55 = vsel %vm35_vm0, %v1077_v57, 0.0  ;;  %v2730_v25 = vld [vmem:[%s2834_s0 + $0x38] sm:$0xff]  ;;  %s1987_s0 = smov 32  }
 0x200   :  { %v1065_v29 = vpop.permute.xlu0 %1064  ;;  %v1130_v45 = vrot.slane %v1129_v55, 4  ;;  %v1196_v58 = vadd.f32 %v1195_v24, %v1194_v61 }
 0x201   :  { %v887_v14 = vrot.slane %v886_v19, 1  ;;  %v1402_v32 = vsel %vm35_vm0, %v1314_v63, 0.0  ;;  %v941_v35 = vrot.slane %v940_v40, 2  ;;  %v1085_v42 = vmul.f32 %v2716_v8, %v1065_v29 }
 0x202   :  { %v1403_v59 = vrot.slane %v1402_v32, 4  ;;  %v1131_v10 = vadd.f32 %v1130_v45, %v1129_v55  ;;  %v1347_v63 = vrot.slane %v2711_v3, 4 }
 0x203   :  { %v888_v49 = vadd.f32 %v887_v14, %v886_v19  ;;  %v1487_v28 = vpop.permute.xlu1 %1486  ;;  %v942_v38 = vadd.f32 %v941_v35, %v940_v40  ;;  %v1185_v11 = vsel %vm35_vm0, %v1085_v42, 0.0 }
 0x204   :  { %v1404_v31 = vadd.f32 %v1403_v59, %v1402_v32  ;;  %v1537_v18 = vmul.f32 %v2638_v41, %v1487_v28  ;;  %v1186_v27 = vrot.slane %v1185_v11, 4  ;;  %v845_v41 = vmul.f32 %v2730_v25, %v2643_v33 }
 0x205   :  { %v989_v34 = vsel %vm988_vm5, %v888_v49, %v2584_v6  ;;  %v943_v47 = vrot.slane %v942_v38, 1  ;;  %v1183_v6 = vrot.slane %v1182_v12, 1  ;;  %v1177_v32 = vadd.f32 %v1176_v5, %v1175_v50 }
 0x206   :  { %v1405_v17 = vrot.slane %v1404_v31, 2  ;;  %v1577_v48 = vsel %vm35_vm0, %v1537_v18, 0.0  ;;  %v2725_v20 = vsel %vm990_vm6, %v895_v7, %v989_v34  ;;  %v1187_v60 = vadd.f32 %v1186_v27, %v1185_v11 }
 0x207   :  { %v1578_v54 = vrot.slane %v1577_v48, 4  ;;  %v2734_v57 = vpop.permute.xlu1 %1518  ;;  %v944_v15 = vadd.f32 %v943_v47, %v942_v38  ;;  %v1126_v7 = vadd.f32 %v1125_v62, %v1124_v9  ;;  %v1307_v33 = vmul.f32 %v2602_v22, %v2645_v39 }
 0x208   :  { %v1406_v19 = vadd.f32 %v1405_v17, %v1404_v31  ;;  %v1188_v40 = vrot.slane %v1187_v60, 2  ;;  %v903_v35 = vsel %vm35_vm0, %v845_v41, 0.0  ;;  %v1132_v59 = vrot.slane %v1131_v10, 2 }
 0x209   :  { %v1579_v14 = vadd.f32 %v1578_v54, %v1577_v48  ;;  %v999_v29 = vsel %vm988_vm5, %v944_v15, %v2594_v23  ;;  %v1184_v24 = vadd.f32 %v1183_v6, %v1182_v12  ;;  %v1197_v49 = vrot.slane %v1196_v58, 1 }
 0x20a   :  { %v1407_v55 = vrot.slane %v1406_v19, 1  ;;  %v1189_v61 = vadd.f32 %v1188_v40, %v1187_v60  ;;  %v2744_v28 = vsel %vm990_vm6, %v2692_v30, %v999_v29  ;;  %v853_v22 = vmul.f32 %v2669_v0, %v2656_v37  ;;  %v1499_v29 = vpop.permute.xlu0 %1498 }
 0x20b   :  { %v1580_v42 = vrot.slane %v1579_v14, 2  ;;  %v904_v38 = vrot.slane %v903_v35, 4  ;;  %v1353_v31 = vsel %vm35_vm0, %v1307_v33, 0.0  ;;  %v1225_v12 = vsel %vm988_vm5, %v1177_v32, %v2687_v43 }
 0x20c   :  { %v1408_v9 = vadd.f32 %v1407_v55, %v1406_v19  ;;  %v1037_v45 = vpop.permute.xlu1 %1036  ;;  %v1190_v39 = vrot.slane %v1189_v61, 1  ;;  %v1133_v18 = vadd.f32 %v1132_v59, %v1131_v10  ;;  %v1198_v37 = vadd.f32 %v1197_v49, %v1196_v58 }
 0x20d   :  { %v1581_v50 = vadd.f32 %v1580_v42, %v1579_v14  ;;  %v1078_v23 = vmul.f32 %v2730_v25, %v1037_v45  ;;  %v1226_v34 = vsel %vm990_vm6, %v1184_v24, %v1225_v12  ;;  %v1127_v17 = vrot.slane %v1126_v7, 1 }
 0x20e   :  { %v1456_v11 = vsel %vm988_vm5, %v1408_v9, %v2630_v26  ;;  %v1191_v5 = vadd.f32 %v1190_v39, %v1189_v61  ;;  %v959_v48 = vsel %vm35_vm0, %v853_v22, 0.0  ;;  %v1121_v10 = vadd.f32 %v1120_v2, %v2689_v46 }
 0x20f   :  { %v1582_v30 = vrot.slane %v1581_v50, 1  ;;  %v1136_v62 = vsel %vm35_vm0, %v1078_v23, 0.0  ;;  %v2758_v47 = vsel %vm990_vm6, %v2694_v53, %v1456_v11  ;;  %v1354_v60 = vrot.slane %v1353_v31, 4 }
 0x210   :  { %v1137_v27 = vrot.slane %v1136_v62, 4  ;;  %v1227_v26 = vsel %vm992_vm8, %v1191_v5, %v1226_v34  ;;  %v905_v58 = vadd.f32 %v904_v38, %v903_v35  ;;  %v1134_v15 = vrot.slane %v1133_v18, 1 }
 0x211   :  { %v1583_v43 = vadd.f32 %v1582_v30, %v1581_v50  ;;  %v1268_v41 = vpop.permute.xlu1 %1267  ;;  %v1228_v6 = vsel %vm994_vm7, %v1198_v37, %v1227_v26  ;;  %v1348_v40 = vadd.f32 %v1347_v63, %v2711_v3  ;;  %v960_v14 = vrot.slane %v959_v48, 4 }
 0x212   :  { %v1138_v54 = vadd.f32 %v1137_v27, %v1136_v62  ;;  %v1309_v53 = vmul.f32 %v2730_v25, %v1268_v41  ;;  %1231 = vrot.lane.b32.xlu0 %v1228_v6, %s1987_s0  ;;  %v1128_v2 = vadd.f32 %v1127_v17, %v1126_v7  ;;  %v1317_v33 = vmul.f32 %v2669_v0, %v2682_v16 }
 0x213   :  { %v1680_v19 = vsel %vm988_vm5, %v1583_v43, %v2662_v36  ;;  %v1355_v55 = vadd.f32 %v1354_v60, %v1353_v31  ;;  %v1218_v61 = vsel %vm988_vm5, %v1121_v10, %v2622_v56  ;;  %v906_v36 = vrot.slane %v905_v58, 2 }
 0x214   :  { %v1139_v32 = vrot.slane %v1138_v54, 2  ;;  %v2773_v46 = vsel %vm990_vm6, %v2705_v44, %v1680_v19  ;;  %v1135_v42 = vadd.f32 %v1134_v15, %v1133_v18  ;;  %v1367_v3 = vsel %vm35_vm0, %v1309_v53, 0.0 }
 0x215   :  { %v1349_v24 = vrot.slane %v1348_v40, 2  ;;  %v961_v44 = vadd.f32 %v960_v14, %v959_v48  ;;  %v1546_v7 = vmul.f32 %v2612_v13, %v2659_v52  ;;  %v1423_v16 = vsel %vm35_vm0, %v1317_v33, 0.0 }
 0x216   :  { %v1140_v35 = vadd.f32 %v1139_v32, %v1138_v54  ;;  %v791_v59 = vpop.permute.xlu1 %790  ;;  %v1540_v9 = vmul.f32 %v2730_v25, %v1499_v29  ;;  %v1219_v56 = vsel %vm990_vm6, %v1128_v2, %v1218_v61  ;;  %v1545_v22 = vmul.f32 %v2653_v4, %v2734_v57 }
 0x217   :  { %v844_v63 = vmul.f32 %v2701_v51, %v791_v59  ;;  %v1368_v50 = vrot.slane %v1367_v3, 4  ;;  %v907_v31 = vadd.f32 %v906_v36, %v905_v58  ;;  %v1356_v12 = vrot.slane %v1355_v55, 2 }
 0x218   :  { %v1141_v49 = vrot.slane %v1140_v35, 1  ;;  %v1220_v52 = vsel %vm992_vm8, %v1135_v42, %v1219_v56  ;;  %v962_v11 = vrot.slane %v961_v44, 2  ;;  %v1350_v5 = vadd.f32 %v1349_v24, %v1348_v40 }
 0x219   :  { %v896_v45 = vsel %vm35_vm0, %v844_v63, 0.0  ;;  %v1424_v30 = vrot.slane %v1423_v16, 4  ;;  %v1598_v62 = vsel %vm35_vm0, %v1540_v9, 0.0  ;;  %v1633_v57 = vsel %vm35_vm0, %v1545_v22, 0.0 }
 0x21a   :  { %v1142_v39 = vadd.f32 %v1141_v49, %v1140_v35  ;;  %v897_v23 = vrot.slane %v896_v45, 4  ;;  %v831_v38 = vpop.permute.xlu1 %830  ;;  %v1369_v27 = vadd.f32 %v1368_v50, %v1367_v3  ;;  %v908_v17 = vrot.slane %v907_v31, 1 }
 0x21b   :  { %v852_v13 = vmul.f32 %v2716_v8, %v831_v38  ;;  %v1357_v48 = vadd.f32 %v1356_v12, %v1355_v55  ;;  %v1640_v43 = vsel %vm35_vm0, %v1546_v7, 0.0  ;;  %v963_v26 = vadd.f32 %v962_v11, %v961_v44 }
 0x21c   :  { %v898_v18 = vadd.f32 %v897_v23, %v896_v45  ;;  %v1221_v25 = vsel %vm994_vm7, %v1142_v39, %v1220_v52  ;;  %v1351_v6 = vrot.slane %v1350_v5, 1  ;;  %v1425_v58 = vadd.f32 %v1424_v30, %v1423_v16 }
 0x21d   :  { %v952_v4 = vsel %vm35_vm0, %v852_v13, 0.0  ;;  %1229 = vrot.lane.b32.xlu1 %v1221_v25, %s1987_s0  ;;  %v1599_v15 = vrot.slane %v1598_v62, 4  ;;  %v1634_v53 = vrot.slane %v1633_v57, 4  ;;  %v1370_v19 = vrot.slane %v1369_v27, 2 }
 0x21e   :  { %v899_v37 = vrot.slane %v898_v18, 2  ;;  %v953_v34 = vrot.slane %v952_v4, 4  ;;  %v909_v2 = vadd.f32 %v908_v17, %v907_v31  ;;  %v1358_v33 = vrot.slane %v1357_v48, 1 }
 0x21f   :  { %v1264_v41 = vpop.permute.xlu1 %1263  ;;  %v1641_v55 = vrot.slane %v1640_v43, 4  ;;  %v964_v59 = vrot.slane %v963_v26, 1  ;;  %v1426_v3 = vrot.slane %v1425_v58, 2  ;;  %v1600_v63 = vadd.f32 %v1599_v15, %v1598_v62 }
 0x220   :  { %v900_v10 = vadd.f32 %v899_v37, %v898_v18  ;;  %v954_v60 = vadd.f32 %v953_v34, %v952_v4  ;;  %v1308_v54 = vmul.f32 %v2701_v51, %v1264_v41  ;;  %v1635_v24 = vadd.f32 %v1634_v53, %v1633_v57 }
 0x221   :  { %v1371_v7 = vadd.f32 %v1370_v19, %v1369_v27  ;;  %v1352_v45 = vadd.f32 %v1351_v6, %v1350_v5  ;;  %v1359_v50 = vadd.f32 %v1358_v33, %v1357_v48  ;;  %v965_v23 = vadd.f32 %v964_v59, %v963_v26 }
 0x222   :  { %v901_v40 = vrot.slane %v900_v10, 1  ;;  %v955_v14 = vrot.slane %v954_v60, 2  ;;  %v1360_v32 = vsel %vm35_vm0, %v1308_v54, 0.0  ;;  %v1642_v38 = vadd.f32 %v1641_v55, %v1640_v43 }
 0x223   :  { %v1361_v29 = vrot.slane %v1360_v32, 4  ;;  %v1296_v35 = vpop.permute.xlu1 %1295  ;;  %v1427_v13 = vadd.f32 %v1426_v3, %v1425_v58  ;;  %v1601_v25 = vrot.slane %v1600_v63, 2  ;;  %v1636_v30 = vrot.slane %v1635_v24, 2 }
 0x224   :  { %v902_v61 = vadd.f32 %v901_v40, %v900_v10  ;;  %v956_v36 = vadd.f32 %v955_v14, %v954_v60  ;;  %v1316_v42 = vmul.f32 %v2716_v8, %v1296_v35  ;;  %v1643_v37 = vrot.slane %v1642_v38, 2 }
 0x225   :  { %v1362_v44 = vadd.f32 %v1361_v29, %v1360_v32  ;;  %v1449_v48 = vsel %vm988_vm5, %v1352_v45, %v2581_v1  ;;  %v1428_v26 = vrot.slane %v1427_v13, 1  ;;  %v1602_v10 = vadd.f32 %v1601_v25, %v1600_v63 }
 0x226   :  { %v957_v49 = vrot.slane %v956_v36, 1  ;;  %v1416_v16 = vsel %vm35_vm0, %v1316_v42, 0.0  ;;  %v993_v9 = vsel %vm992_vm8, %v902_v61, %v2725_v20  ;;  %v1372_v20 = vrot.slane %v1371_v7, 1 }
 0x227   :  { %v1363_v56 = vrot.slane %v1362_v44, 2  ;;  %v1417_v22 = vrot.slane %v1416_v16, 4  ;;  %v995_v39 = vsel %vm994_vm7, %v909_v2, %v993_v9  ;;  %v1637_v6 = vadd.f32 %v1636_v30, %v1635_v24 }
 0x228   :  { %v958_v31 = vadd.f32 %v957_v49, %v956_v36  ;;  %v1495_v12 = vpop.permute.xlu1 %1494  ;;  %1005 = vst.msk [vmem:[#allocation2] sm:$0xff] %vm35_vm0, %v995_v39  ;;  %v1373_v60 = vadd.f32 %v1372_v20, %v1371_v7  ;;  %v1644_v2 = vadd.f32 %v1643_v37, %v1642_v38  ;;  %v1429_v29 = vadd.f32 %v1428_v26, %v1427_v13 }
 0x229   :  { %v1364_v52 = vadd.f32 %v1363_v56, %v1362_v44  ;;  %v1418_v11 = vadd.f32 %v1417_v22, %v1416_v16  ;;  %v1539_v18 = vmul.f32 %v2701_v51, %v1495_v12  ;;  %v1603_v35 = vrot.slane %v1602_v10, 1 }
 0x22a   :  { %v1001_v5 = vsel %vm992_vm8, %v958_v31, %v2744_v28  ;;  %v1450_v28 = vsel %vm990_vm6, %v1359_v50, %v1449_v48  ;;  %v1638_v59 = vrot.slane %v1637_v6, 1  ;;  %v1645_v9 = vrot.slane %v1644_v2, 1 }
 0x22b   :  { %v1365_v62 = vrot.slane %v1364_v52, 1  ;;  %v1419_v4 = vrot.slane %v1418_v11, 2  ;;  %v1591_v57 = vsel %vm35_vm0, %v1539_v18, 0.0  ;;  %v1002_v27 = vsel %vm994_vm7, %v965_v23, %v1001_v5 }
 0x22c   :  { %v1592_v34 = vrot.slane %v1591_v57, 4  ;;  %v1527_v17 = vpop.permute.xlu1 %1526  ;;  %1006 = vst.msk [vmem:[#allocation2 + $0x8] sm:$0xff] %vm35_vm0, %v1002_v27  ;;  %v1604_v49 = vadd.f32 %v1603_v35, %v1602_v10  ;;  %v1639_v16 = vadd.f32 %v1638_v59, %v1637_v6  ;;  %v1646_v38 = vadd.f32 %v1645_v9, %v1644_v2 }
 0x22d   :  { %v1366_v51 = vadd.f32 %v1365_v62, %v1364_v52  ;;  %v1420_v43 = vadd.f32 %v1419_v4, %v1418_v11  ;;  %v1547_v41 = vmul.f32 %v2716_v8, %v1527_v17 }
 0x22e   :  { %v1593_v54 = vadd.f32 %v1592_v34, %v1591_v57  ;;  %v1687_v23 = vsel %vm988_vm5, %v1639_v16, %v2673_v21 }
 0x22f   :  { %v1421_v58 = vrot.slane %v1420_v43, 1  ;;  %v1647_v15 = vsel %vm35_vm0, %v1547_v41, 0.0  ;;  %v1451_v53 = vsel %vm992_vm8, %v1366_v51, %v1450_v28  ;;  %v1688_v13 = vsel %vm990_vm6, %v1646_v38, %v1687_v23 }
 0x230   :  { %v1594_v19 = vrot.slane %v1593_v54, 2  ;;  %v1648_v1 = vrot.slane %v1647_v15, 4  ;;  %v1531_v40 = vpop.permute.xlu1 %1530  ;;  %v1452_v14 = vsel %vm994_vm7, %v1373_v60, %v1451_v53 }
 0x231   :  { %v1422_v32 = vadd.f32 %v1421_v58, %v1420_v43  ;;  %v1548_v8 = vmul.f32 %v2669_v0, %v1531_v40  ;;  %1460 = vrot.lane.b32.xlu1 %v1452_v14, %s1988_s2 }
 0x232   :  { %v1595_v33 = vadd.f32 %v1594_v19, %v1593_v54  ;;  %v1649_v55 = vadd.f32 %v1648_v1, %v1647_v15 }
 0x233   :  { %v1654_v61 = vsel %vm35_vm0, %v1548_v8, 0.0  ;;  %v1458_v36 = vsel %vm992_vm8, %v1422_v32, %v2758_v47 }
 0x234   :  { %v1596_v42 = vrot.slane %v1595_v33, 1  ;;  %v1650_v3 = vrot.slane %v1649_v55, 2  ;;  %v1655_v63 = vrot.slane %v1654_v61, 4  ;;  %v1459_v24 = vsel %vm994_vm7, %v1429_v29, %v1458_v36 }
 0x235   :  { %1462 = vrot.lane.b32.xlu0 %v1459_v24, %s1988_s2 }
 0x236   :  { %v1597_v0 = vadd.f32 %v1596_v42, %v1595_v33  ;;  %v1651_v44 = vadd.f32 %v1650_v3, %v1649_v55  ;;  %v1656_v7 = vadd.f32 %v1655_v63, %v1654_v61 }
 0x238   :  { %v1652_v45 = vrot.slane %v1651_v44, 1  ;;  %v1657_v56 = vrot.slane %v1656_v7, 2  ;;  %v1682_v22 = vsel %vm992_vm8, %v1597_v0, %v2773_v46 }
 0x239   :  { %v1683_v39 = vsel %vm994_vm7, %v1604_v49, %v1682_v22 }
 0x23a   :  { %v1658_v47 = vadd.f32 %v1657_v56, %v1656_v7  ;;  %1691 = vrot.lane.b32.xlu1 %v1683_v39, %s1989_s30  ;;  %v1653_v50 = vadd.f32 %v1652_v45, %v1651_v44 }
 0x23c   :  { %v1659_v31 = vrot.slane %v1658_v47, 1  ;;  %v1689_v52 = vsel %vm992_vm8, %v1653_v50, %v1688_v13 }
 0x23e   :  { %v1660_v12 = vadd.f32 %v1659_v31, %v1658_v47 }
 0x240   :  { %v1690_v11 = vsel %vm994_vm7, %v1660_v12, %v1689_v52 }
 0x241   :  { %1693 = vrot.lane.b32.xlu0 %v1690_v11, %s1989_s30 }
 0x284   :  { %v1232_v46 = vpop.permute.xlu0 %1231 }
 0x285   :  { %1237 = vst.msk [vmem:[#allocation2 + $0x8] sm:$0xff] %vm1235_vm9, %v1232_v46 }
 0x28f   :  { %v1230_v18 = vpop.permute.xlu1 %1229 }
 0x290   :  { %1236 = vst.msk [vmem:[#allocation2] sm:$0xff] %vm1235_vm9, %v1230_v18 }
 0x2a3   :  { %v1461_v25 = vpop.permute.xlu1 %1460 }
 0x2a4   :  { %1467 = vst.msk [vmem:[#allocation2] sm:$0xff] %vm1466_vm10, %v1461_v25 }
 0x2a7   :  { %v1463_v30 = vpop.permute.xlu0 %1462 }
 0x2a8   :  { %1468 = vst.msk [vmem:[#allocation2 + $0x8] sm:$0xff] %vm1466_vm10, %v1463_v30 }
 0x2ac   :  { %v1692_v21 = vpop.permute.xlu1 %1691 }
 0x2ad   :  { %1698 = vst.msk [vmem:[#allocation2] sm:$0xff] %vm1697_vm11, %v1692_v21 }
 0x2b3   :  { %v1694_v20 = vpop.permute.xlu0 %1693 }
 0x2b4   :  { %1699 = vst.msk [vmem:[#allocation2 + $0x8] sm:$0xff] %vm1697_vm11, %v1694_v20 }
 0x2b5   :  { %1972 = shalt.err (!%p1969_p4)
}
 0x2b6   :  { %s1991_s7 = smov 128   ;;  %s1992_s8 = smov 8  }
 0x2b7   :  { %1711 = dma.vmem_to_hbm [thread:$0]  %s1706_s5, 256, %s2837_s3, [#allocation3], %s1991_s7, %s1991_s7, %s1992_s8  }
 0x2b8   :  { %1981 = dma.done.wait [#allocation3], 256  }
 0x2b9   :  { %1982 = vsyncadd [#allocation3], 4294967040 }
 0x2ba   :  { %1715 = vsyncpa [#allocation3], 1 }

</bundles_post_ra>
